<compile_context>
chip_gen: v7x
topology: tpu7x:2x2x1
jax: 0.10.0
libtpu: 0.0.40
codegen_flags: <defaults>
</compile_context>

<pallas_src>
import math
from functools import partial

import jax
import jax.numpy as jnp
import numpy as np
from jax.experimental import pallas as pl
from jax.experimental.pallas import tpu as pltpu


def _mm_nt(a, b):
    """a @ b.T (contract last dim of both); bf16 MXU operands, f32 accumulation."""
    return jax.lax.dot_general(
        a.astype(jnp.bfloat16), b.astype(jnp.bfloat16),
        (((1,), (1,)), ((), ())),
        preferred_element_type=jnp.float32)


def _leaky_relu(x, slope=0.01):
    return jnp.where(x >= 0, x, slope * x)


def smha_linear_kernel(nhead, B, L, E, H1, H2,
                       x_ref, w_ref, p_ref, out_ref):
    Dh = E // nhead
    BL = B * L

    # ---- static views of the packed parameter slabs -------------------------
    # bf16 weight slab (row offsets 0 / 3E / 4E / 4E+H1 are multiples of 16)
    w_in = w_ref[0:3 * E, 0:E]                              # (3E, E), Q rows pre-scaled
    w_out = w_ref[3 * E:4 * E, 0:E]                         # (E, E)
    w1 = w_ref[4 * E:4 * E + H1, 0:E]                       # (H1, E)
    w2 = w_ref[4 * E + H1:4 * E + H1 + H2, 0:H1]            # (H2, H1)

    # f32 bias / affine slab
    gamma = p_ref[0:B, 0:E]                                 # (B, E)
    beta = p_ref[B:2 * B, 0:E]                              # (B, E)
    b_in = p_ref[2 * B:2 * B + 1, 0:3 * E]                  # (1, 3E), Q part pre-scaled
    b_out = p_ref[2 * B + 1:2 * B + 2, 0:E]                 # (1, E)
    b1 = p_ref[2 * B + 2:2 * B + 3, 0:H1]                   # (1, H1)
    b2 = p_ref[2 * B + 3:2 * B + 4, 0:H2]                   # (1, H2)

    xf = x_ref[...]                                         # (B*L, E) f32

    # ---- fused QKV in-projection: one wide bf16 matmul, f32 accumulate ------
    qkv = _mm_nt(xf, w_in) + b_in                           # (B*L, 3E) f32
    qkv_b = qkv.astype(jnp.bfloat16)

    # ---- split into (nhead*B, L, Dh) batched attention operands -------------
    def heads(off):
        t = jnp.stack([qkv_b[:, off + h * Dh: off + (h + 1) * Dh]
                       for h in range(nhead)], axis=0)      # (nhead, B*L, Dh)
        return t.reshape(nhead * B, L, Dh)

    q = heads(0)
    k = heads(E)
    v = heads(2 * E)

    # ---- attention: one batched score matmul + one stacked softmax ----------
    s = jnp.einsum('nld,nmd->nlm', q, k,
                   preferred_element_type=jnp.float32)      # (nhead*B, L, L) f32
    s = s - jnp.max(s, axis=-1, keepdims=True)
    p = jnp.exp(s)
    p = p * pl.reciprocal(jnp.sum(p, axis=-1, keepdims=True), approx=True)
    ctx = jnp.einsum('nlm,nmd->nld', p.astype(jnp.bfloat16), v,
                     preferred_element_type=jnp.float32)    # (nhead*B, L, Dh) f32

    # ---- heads stay in registers: flat lane concat, then one wide out-proj --
    ctx_b = ctx.astype(jnp.bfloat16).reshape(nhead, BL, Dh)
    attn = jnp.concatenate([ctx_b[h] for h in range(nhead)], axis=-1)  # (B*L, E)
    o = _mm_nt(attn, w_out) + b_out                         # (B*L, E) f32

    # ---- LayerNorm over (batch, embed) per sequence position ----------------
    h3 = o.reshape(B, L, E)
    inv_ne = 1.0 / float(B * E)
    mu = jnp.sum(jnp.sum(h3, axis=2, keepdims=True), axis=0, keepdims=True) * inv_ne
    d = h3 - mu
    var = jnp.sum(jnp.sum(d * d, axis=2, keepdims=True), axis=0, keepdims=True) * inv_ne
    hn = d * jax.lax.rsqrt(var + 1e-5)
    hn = hn * gamma[:, None, :] + beta[:, None, :]          # (B, L, E) f32
    hf = hn.reshape(BL, E)

    # ---- linear1 -> LeakyReLU -> linear2 -> LeakyReLU ------------------------
    h1 = _leaky_relu(_mm_nt(hf, w1) + b1)                   # (B*L, H1) f32
    h2 = _leaky_relu(_mm_nt(h1, w2) + b2)                   # (B*L, H2) f32

    # ---- mean over feature dim as a tiny matvec; lane-dense (1, B*L) store ---
    mean_w = jnp.full((1, H2), 1.0 / float(H2), dtype=jnp.float32)
    out_ref[...] = _mm_nt(mean_w, h2)                       # (1, B*L)


@partial(jax.jit, static_argnums=(2,))
def smha_linear_classifier(x, params, nhead):
    """x: (L, B, E) seq-first (PyTorch layout). Returns (L, B)."""
    L, B, E = x.shape
    Dh = E // nhead
    scale = 1.0 / math.sqrt(Dh)
    H1, H2 = params["w1"].shape[0], params["w2"].shape[0]
    P = 3 * E  # lane width of the f32 param slab

    # ---- pack all MXU weights into one bf16 slab (Q scale folded into w_in) --
    w_in_s = jnp.concatenate([params["w_in"][:E] * scale, params["w_in"][E:]], axis=0)
    w2_pad = jnp.pad(params["w2"], ((0, 0), (0, E - H1)))
    wslab = jnp.concatenate(
        [w_in_s, params["w_out"], params["w1"], w2_pad], axis=0
    ).astype(jnp.bfloat16)                                  # (4E + H1 + H2, E)

    # ---- pack biases + gamma/beta into one small f32 slab --------------------
    b_in_s = jnp.concatenate([params["b_in"][:E] * scale, params["b_in"][E:]], axis=0)

    def vrow(v):   # 1-D vector -> one (1, P) lane-padded row
        return jnp.pad(v, (0, P - v.shape[0]))[None, :]

    def mrows(m):  # (r, c<=P) matrix -> (r, P) lane-padded rows
        return jnp.pad(m, ((0, 0), (0, P - m.shape[1])))

    pslab = jnp.concatenate(
        [mrows(params["gamma"]), mrows(params["beta"]),
         vrow(b_in_s), vrow(params["b_out"]), vrow(params["b1"]), vrow(params["b2"])],
        axis=0).astype(jnp.float32)                         # (2B + 4, 3E)

    # ---- flatten x to (B*L, E) in the wrapper (free in XLA) ------------------
    x2 = jnp.transpose(x, (1, 0, 2)).reshape(B * L, E)

    kernel = partial(smha_linear_kernel, nhead, B, L, E, H1, H2)
    out = pl.pallas_call(
        kernel,
        out_shape=jax.ShapeDtypeStruct((1, B * L), jnp.float32),
        in_specs=[pl.BlockSpec(memory_space=pltpu.MemorySpace.VMEM)] * 3,
        out_specs=pl.BlockSpec(memory_space=pltpu.MemorySpace.VMEM),
    )(x2, wslab, pslab)

    return out.reshape(B, L).T                              # (L, B)


def reference(x, params, nhead):
    """Pure-JAX reference replicating PyTorch nn.MultiheadAttention forward."""
    L, N, E = x.shape
    Dh = E // nhead
    hp = jax.lax.Precision.HIGHEST
    qkv = jnp.einsum("lne,fe->lnf", x, params["w_in"], precision=hp) + params["b_in"]
    q, k, v = jnp.split(qkv, 3, axis=-1)
    q = q.reshape(L, N, nhead, Dh)
    k = k.reshape(L, N, nhead, Dh)
    v = v.reshape(L, N, nhead, Dh)
    s = jnp.einsum("lnhd,mnhd->nhlm", q, k, precision=hp) / math.sqrt(Dh)
    p = jax.nn.softmax(s, axis=-1)
    o = jnp.einsum("nhlm,mnhd->lnhd", p, v, precision=hp).reshape(L, N, E)
    o = jnp.einsum("lne,fe->lnf", o, params["w_out"], precision=hp) + params["b_out"]
    mu = o.mean(axis=(1, 2), keepdims=True)
    var = ((o - mu) ** 2).mean(axis=(1, 2), keepdims=True)
    o = (o - mu) / jnp.sqrt(var + 1e-5) * params["gamma"] + params["beta"]
    h1 = jnp.einsum("lne,fe->lnf", o, params["w1"], precision=hp) + params["b1"]
    h1 = jnp.where(h1 >= 0, h1, 0.01 * h1)
    h2 = jnp.einsum("lnf,gf->lng", h1, params["w2"], precision=hp) + params["b2"]
    h2 = jnp.where(h2 >= 0, h2, 0.01 * h2)
    return h2.mean(axis=2)                                  # (L, N)


if __name__ == "__main__":
    # Module config: size = (N, E), nhead, hidden_size == E
    L, N, E = 8, 4, 32
    NHEAD = 4
    HIDDEN = E
    H1 = HIDDEN // 2                 # 16
    H2 = int(HIDDEN / 6)             # 5

    key = jax.random.PRNGKey(0)
    ks = jax.random.split(key, 12)

    def rnd(k, shape, scale=0.1):
        return scale * jax.random.normal(k, shape, jnp.float32)

    params = {
        "w_in": rnd(ks[0], (3 * E, E)),
        "b_in": rnd(ks[1], (3 * E,), 0.01),
        "w_out": rnd(ks[2], (E, E)),
        "b_out": rnd(ks[3], (E,), 0.01),
        "gamma": 1.0 + rnd(ks[4], (N, E)),
        "beta": rnd(ks[5], (N, E), 0.01),
        "w1": rnd(ks[6], (H1, E)),
        "b1": rnd(ks[7], (H1,), 0.01),
        "w2": rnd(ks[8], (H2, H1)),
        "b2": rnd(ks[9], (H2,), 0.01),
    }
    x = jax.random.normal(ks[10], (L, N, E), jnp.float32)

    out = smha_linear_classifier(x, params, NHEAD)
    out = jax.block_until_ready(out)
    assert out.shape == (L, N), out.shape

    ref = jax.block_until_ready(reference(x, params, NHEAD))
    # Kernel feeds the MXU bf16 operands (f32 accumulation) and uses the EUP
    # approx reciprocal in the softmax; the reference runs HIGHEST-precision f32,
    # so the comparison bound is set to 1e-2 (observed error is a few 1e-3).
    np.testing.assert_allclose(np.asarray(out), np.asarray(ref), rtol=1e-2, atol=1e-2)

    print("KERNEL_OK")
</pallas_src>

<mosaic_0001>
module attributes {stable_mosaic.version = 11 : i64} {
  func.func @smha_linear_kernel(%arg0: memref<32x32xf32, #tpu.memory_space<vmem>>, %arg1: memref<149x32xbf16, #tpu.memory_space<vmem>>, %arg2: memref<12x96xf32, #tpu.memory_space<vmem>>, %arg3: memref<1x32xf32, #tpu.memory_space<vmem>>) attributes {dimension_semantics = [], scalar_prefetch = 0 : i64, scratch_operands = 0 : i64, tpu.core_type = #tpu.core_type<tc>} {
    %c0 = arith.constant 0 : index
    %c0_0 = arith.constant 0 : index
    %0 = vector.load %arg1[%c0, %c0_0] : memref<149x32xbf16, #tpu.memory_space<vmem>>, vector<96x32xbf16>
    %c96 = arith.constant 96 : index
    %c0_1 = arith.constant 0 : index
    %1 = vector.load %arg1[%c96, %c0_1] : memref<149x32xbf16, #tpu.memory_space<vmem>>, vector<32x32xbf16>
    %c128 = arith.constant 128 : index
    %c0_2 = arith.constant 0 : index
    %2 = vector.load %arg1[%c128, %c0_2] : memref<149x32xbf16, #tpu.memory_space<vmem>>, vector<16x32xbf16>
    %c144 = arith.constant 144 : index
    %c0_3 = arith.constant 0 : index
    %3 = vector.load %arg1[%c144, %c0_3] : memref<149x32xbf16, #tpu.memory_space<vmem>>, vector<5x16xbf16>
    %c0_4 = arith.constant 0 : index
    %c0_5 = arith.constant 0 : index
    %4 = vector.load %arg2[%c0_4, %c0_5] : memref<12x96xf32, #tpu.memory_space<vmem>>, vector<4x32xf32>
    %c4 = arith.constant 4 : index
    %c0_6 = arith.constant 0 : index
    %5 = vector.load %arg2[%c4, %c0_6] : memref<12x96xf32, #tpu.memory_space<vmem>>, vector<4x32xf32>
    %c8 = arith.constant 8 : index
    %c0_7 = arith.constant 0 : index
    %6 = vector.load %arg2[%c8, %c0_7] : memref<12x96xf32, #tpu.memory_space<vmem>>, vector<1x96xf32>
    %c9 = arith.constant 9 : index
    %c0_8 = arith.constant 0 : index
    %7 = vector.load %arg2[%c9, %c0_8] : memref<12x96xf32, #tpu.memory_space<vmem>>, vector<1x32xf32>
    %c10 = arith.constant 10 : index
    %c0_9 = arith.constant 0 : index
    %8 = vector.load %arg2[%c10, %c0_9] : memref<12x96xf32, #tpu.memory_space<vmem>>, vector<1x16xf32>
    %c11 = arith.constant 11 : index
    %c0_10 = arith.constant 0 : index
    %9 = vector.load %arg2[%c11, %c0_10] : memref<12x96xf32, #tpu.memory_space<vmem>>, vector<1x5xf32>
    %c0_11 = arith.constant 0 : index
    %c0_12 = arith.constant 0 : index
    %10 = vector.load %arg0[%c0_11, %c0_12] : memref<32x32xf32, #tpu.memory_space<vmem>>, vector<32x32xf32>
    %11 = arith.truncf %10 : vector<32x32xf32> to vector<32x32xbf16>
    %cst = arith.constant dense<0.000000e+00> : vector<32x96xf32>
    %12 = tpu.matmul %11, %0, %cst {dimension_numbers = #tpu.dot_dimension_numbers<[1], [1], [0], [0], [0, 0, 1, 0], [], []>} : vector<32x32xbf16>, vector<96x32xbf16>, vector<32x96xf32> -> vector<32x96xf32>
    %13 = vector.broadcast %6 : vector<1x96xf32> to vector<32x96xf32>
    %14 = arith.addf %12, %13 : vector<32x96xf32>
    %15 = arith.truncf %14 : vector<32x96xf32> to vector<32x96xbf16>
    %16 = vector.extract_strided_slice %15 {offsets = [0, 0], sizes = [32, 8], strides = [1, 1]} : vector<32x96xbf16> to vector<32x8xbf16>
    %17 = vector.extract_strided_slice %15 {offsets = [0, 8], sizes = [32, 8], strides = [1, 1]} : vector<32x96xbf16> to vector<32x8xbf16>
    %18 = vector.extract_strided_slice %15 {offsets = [0, 16], sizes = [32, 8], strides = [1, 1]} : vector<32x96xbf16> to vector<32x8xbf16>
    %19 = vector.extract_strided_slice %15 {offsets = [0, 24], sizes = [32, 8], strides = [1, 1]} : vector<32x96xbf16> to vector<32x8xbf16>
    %20 = vector.shape_cast %16 : vector<32x8xbf16> to vector<1x32x8xbf16>
    %21 = vector.shape_cast %17 : vector<32x8xbf16> to vector<1x32x8xbf16>
    %22 = vector.shape_cast %18 : vector<32x8xbf16> to vector<1x32x8xbf16>
    %23 = vector.shape_cast %19 : vector<32x8xbf16> to vector<1x32x8xbf16>
    %24 = tpu.concatenate %20, %21, %22, %23 in 0 : vector<1x32x8xbf16>, vector<1x32x8xbf16>, vector<1x32x8xbf16>, vector<1x32x8xbf16> -> vector<4x32x8xbf16>
    %25 = vector.shape_cast %24 : vector<4x32x8xbf16> to vector<16x8x8xbf16>
    %26 = vector.extract_strided_slice %15 {offsets = [0, 32], sizes = [32, 8], strides = [1, 1]} : vector<32x96xbf16> to vector<32x8xbf16>
    %27 = vector.extract_strided_slice %15 {offsets = [0, 40], sizes = [32, 8], strides = [1, 1]} : vector<32x96xbf16> to vector<32x8xbf16>
    %28 = vector.extract_strided_slice %15 {offsets = [0, 48], sizes = [32, 8], strides = [1, 1]} : vector<32x96xbf16> to vector<32x8xbf16>
    %29 = vector.extract_strided_slice %15 {offsets = [0, 56], sizes = [32, 8], strides = [1, 1]} : vector<32x96xbf16> to vector<32x8xbf16>
    %30 = vector.shape_cast %26 : vector<32x8xbf16> to vector<1x32x8xbf16>
    %31 = vector.shape_cast %27 : vector<32x8xbf16> to vector<1x32x8xbf16>
    %32 = vector.shape_cast %28 : vector<32x8xbf16> to vector<1x32x8xbf16>
    %33 = vector.shape_cast %29 : vector<32x8xbf16> to vector<1x32x8xbf16>
    %34 = tpu.concatenate %30, %31, %32, %33 in 0 : vector<1x32x8xbf16>, vector<1x32x8xbf16>, vector<1x32x8xbf16>, vector<1x32x8xbf16> -> vector<4x32x8xbf16>
    %35 = vector.shape_cast %34 : vector<4x32x8xbf16> to vector<16x8x8xbf16>
    %36 = vector.extract_strided_slice %15 {offsets = [0, 64], sizes = [32, 8], strides = [1, 1]} : vector<32x96xbf16> to vector<32x8xbf16>
    %37 = vector.extract_strided_slice %15 {offsets = [0, 72], sizes = [32, 8], strides = [1, 1]} : vector<32x96xbf16> to vector<32x8xbf16>
    %38 = vector.extract_strided_slice %15 {offsets = [0, 80], sizes = [32, 8], strides = [1, 1]} : vector<32x96xbf16> to vector<32x8xbf16>
    %39 = vector.extract_strided_slice %15 {offsets = [0, 88], sizes = [32, 8], strides = [1, 1]} : vector<32x96xbf16> to vector<32x8xbf16>
    %40 = vector.shape_cast %36 : vector<32x8xbf16> to vector<1x32x8xbf16>
    %41 = vector.shape_cast %37 : vector<32x8xbf16> to vector<1x32x8xbf16>
    %42 = vector.shape_cast %38 : vector<32x8xbf16> to vector<1x32x8xbf16>
    %43 = vector.shape_cast %39 : vector<32x8xbf16> to vector<1x32x8xbf16>
    %44 = tpu.concatenate %40, %41, %42, %43 in 0 : vector<1x32x8xbf16>, vector<1x32x8xbf16>, vector<1x32x8xbf16>, vector<1x32x8xbf16> -> vector<4x32x8xbf16>
    %45 = vector.shape_cast %44 : vector<4x32x8xbf16> to vector<16x8x8xbf16>
    "tpu.trace_start"() <{level = 10 : i32, message = "nld,nmd->nlm"}> : () -> ()
    %cst_13 = arith.constant dense<0.000000e+00> : vector<16x8x8xf32>
    %46 = tpu.matmul %25, %35, %cst_13 {dimension_numbers = #tpu.dot_dimension_numbers<[2], [2], [1], [1], [0, 0, 0, 1, 1, 1], [0], [0]>} : vector<16x8x8xbf16>, vector<16x8x8xbf16>, vector<16x8x8xf32> -> vector<16x8x8xf32>
    "tpu.trace_stop"() : () -> ()
    %cst_14 = arith.constant dense<0xFF800000> : vector<16x8xf32>
    %47 = vector.multi_reduction <maximumf>, %46, %cst_14 [2] : vector<16x8x8xf32> to vector<16x8xf32>
    %48 = vector.shape_cast %47 : vector<16x8xf32> to vector<16x8x1xf32>
    %49 = vector.broadcast %48 : vector<16x8x1xf32> to vector<16x8x8xf32>
    %50 = arith.subf %46, %49 : vector<16x8x8xf32>
    %51 = math.exp %50 : vector<16x8x8xf32>
    %cst_15 = arith.constant dense<0.000000e+00> : vector<16x8xf32>
    %52 = vector.multi_reduction <add>, %51, %cst_15 [2] : vector<16x8x8xf32> to vector<16x8xf32>
    %53 = vector.shape_cast %52 : vector<16x8xf32> to vector<16x8x1xf32>
    %54 = tpu.reciprocal %53 {approx = true} : vector<16x8x1xf32> -> vector<16x8x1xf32>
    %55 = vector.broadcast %54 : vector<16x8x1xf32> to vector<16x8x8xf32>
    %56 = arith.mulf %51, %55 : vector<16x8x8xf32>
    %57 = arith.truncf %56 : vector<16x8x8xf32> to vector<16x8x8xbf16>
    "tpu.trace_start"() <{level = 10 : i32, message = "nlm,nmd->nld"}> : () -> ()
    %cst_16 = arith.constant dense<0.000000e+00> : vector<16x8x8xf32>
    %58 = tpu.matmul %57, %45, %cst_16 {dimension_numbers = #tpu.dot_dimension_numbers<[2], [1], [1], [2], [0, 0, 0, 1, 1, 2], [0], [0]>} : vector<16x8x8xbf16>, vector<16x8x8xbf16>, vector<16x8x8xf32> -> vector<16x8x8xf32>
    "tpu.trace_stop"() : () -> ()
    %59 = arith.truncf %58 : vector<16x8x8xf32> to vector<16x8x8xbf16>
    %60 = vector.shape_cast %59 : vector<16x8x8xbf16> to vector<4x32x8xbf16>
    %61 = vector.extract_strided_slice %60 {offsets = [0, 0, 0], sizes = [1, 32, 8], strides = [1, 1, 1]} : vector<4x32x8xbf16> to vector<1x32x8xbf16>
    %62 = vector.shape_cast %61 : vector<1x32x8xbf16> to vector<32x8xbf16>
    %63 = vector.extract_strided_slice %60 {offsets = [1, 0, 0], sizes = [1, 32, 8], strides = [1, 1, 1]} : vector<4x32x8xbf16> to vector<1x32x8xbf16>
    %64 = vector.shape_cast %63 : vector<1x32x8xbf16> to vector<32x8xbf16>
    %65 = vector.extract_strided_slice %60 {offsets = [2, 0, 0], sizes = [1, 32, 8], strides = [1, 1, 1]} : vector<4x32x8xbf16> to vector<1x32x8xbf16>
    %66 = vector.shape_cast %65 : vector<1x32x8xbf16> to vector<32x8xbf16>
    %67 = vector.extract_strided_slice %60 {offsets = [3, 0, 0], sizes = [1, 32, 8], strides = [1, 1, 1]} : vector<4x32x8xbf16> to vector<1x32x8xbf16>
    %68 = vector.shape_cast %67 : vector<1x32x8xbf16> to vector<32x8xbf16>
    %69 = tpu.concatenate %62, %64, %66, %68 in 1 : vector<32x8xbf16>, vector<32x8xbf16>, vector<32x8xbf16>, vector<32x8xbf16> -> vector<32x32xbf16>
    %cst_17 = arith.constant dense<0.000000e+00> : vector<32x32xf32>
    %70 = tpu.matmul %69, %1, %cst_17 {dimension_numbers = #tpu.dot_dimension_numbers<[1], [1], [0], [0], [0, 0, 1, 0], [], []>} : vector<32x32xbf16>, vector<32x32xbf16>, vector<32x32xf32> -> vector<32x32xf32>
    %71 = vector.broadcast %7 : vector<1x32xf32> to vector<32x32xf32>
    %72 = arith.addf %70, %71 : vector<32x32xf32>
    %73 = vector.shape_cast %72 : vector<32x32xf32> to vector<4x8x32xf32>
    %cst_18 = arith.constant dense<0.000000e+00> : vector<4x8xf32>
    %74 = vector.multi_reduction <add>, %73, %cst_18 [2] : vector<4x8x32xf32> to vector<4x8xf32>
    %75 = vector.shape_cast %74 : vector<4x8xf32> to vector<4x8x1xf32>
    %cst_19 = arith.constant dense<0.000000e+00> : vector<8x1xf32>
    %76 = vector.multi_reduction <add>, %75, %cst_19 [0] : vector<4x8x1xf32> to vector<8x1xf32>
    %77 = vector.shape_cast %76 : vector<8x1xf32> to vector<1x8x1xf32>
    %cst_20 = arith.constant 7.812500e-03 : f32
    %78 = vector.broadcast %cst_20 : f32 to vector<1x8x1xf32>
    %79 = arith.mulf %77, %78 : vector<1x8x1xf32>
    %80 = vector.broadcast %79 : vector<1x8x1xf32> to vector<4x8x32xf32>
    %81 = arith.subf %73, %80 : vector<4x8x32xf32>
    %82 = arith.mulf %81, %81 : vector<4x8x32xf32>
    %cst_21 = arith.constant dense<0.000000e+00> : vector<4x8xf32>
    %83 = vector.multi_reduction <add>, %82, %cst_21 [2] : vector<4x8x32xf32> to vector<4x8xf32>
    %84 = vector.shape_cast %83 : vector<4x8xf32> to vector<4x8x1xf32>
    %cst_22 = arith.constant dense<0.000000e+00> : vector<8x1xf32>
    %85 = vector.multi_reduction <add>, %84, %cst_22 [0] : vector<4x8x1xf32> to vector<8x1xf32>
    %86 = vector.shape_cast %85 : vector<8x1xf32> to vector<1x8x1xf32>
    %cst_23 = arith.constant 7.812500e-03 : f32
    %87 = vector.broadcast %cst_23 : f32 to vector<1x8x1xf32>
    %88 = arith.mulf %86, %87 : vector<1x8x1xf32>
    %cst_24 = arith.constant 9.99999974E-6 : f32
    %89 = vector.broadcast %cst_24 : f32 to vector<1x8x1xf32>
    %90 = arith.addf %88, %89 : vector<1x8x1xf32>
    %91 = math.rsqrt %90 : vector<1x8x1xf32>
    %92 = vector.broadcast %91 : vector<1x8x1xf32> to vector<4x8x32xf32>
    %93 = arith.mulf %81, %92 : vector<4x8x32xf32>
    %94 = vector.shape_cast %4 : vector<4x32xf32> to vector<4x1x32xf32>
    %95 = vector.broadcast %94 : vector<4x1x32xf32> to vector<4x8x32xf32>
    %96 = arith.mulf %93, %95 : vector<4x8x32xf32>
    %97 = vector.shape_cast %5 : vector<4x32xf32> to vector<4x1x32xf32>
    %98 = vector.broadcast %97 : vector<4x1x32xf32> to vector<4x8x32xf32>
    %99 = arith.addf %96, %98 : vector<4x8x32xf32>
    %100 = vector.shape_cast %99 : vector<4x8x32xf32> to vector<32x32xf32>
    %101 = arith.truncf %100 : vector<32x32xf32> to vector<32x32xbf16>
    %cst_25 = arith.constant dense<0.000000e+00> : vector<32x16xf32>
    %102 = tpu.matmul %101, %2, %cst_25 {dimension_numbers = #tpu.dot_dimension_numbers<[1], [1], [0], [0], [0, 0, 1, 0], [], []>} : vector<32x32xbf16>, vector<16x32xbf16>, vector<32x16xf32> -> vector<32x16xf32>
    %103 = vector.broadcast %8 : vector<1x16xf32> to vector<32x16xf32>
    %104 = arith.addf %102, %103 : vector<32x16xf32>
    %cst_26 = arith.constant 0.000000e+00 : f32
    %105 = vector.broadcast %cst_26 : f32 to vector<32x16xf32>
    %106 = arith.cmpf oge, %104, %105 : vector<32x16xf32>
    %cst_27 = arith.constant 0.00999999977 : f32
    %107 = vector.broadcast %cst_27 : f32 to vector<32x16xf32>
    %108 = arith.mulf %107, %104 : vector<32x16xf32>
    %109 = arith.select %106, %104, %108 : vector<32x16xi1>, vector<32x16xf32>
    %110 = arith.truncf %109 : vector<32x16xf32> to vector<32x16xbf16>
    %cst_28 = arith.constant dense<0.000000e+00> : vector<32x5xf32>
    %111 = tpu.matmul %110, %3, %cst_28 {dimension_numbers = #tpu.dot_dimension_numbers<[1], [1], [0], [0], [0, 0, 1, 0], [], []>} : vector<32x16xbf16>, vector<5x16xbf16>, vector<32x5xf32> -> vector<32x5xf32>
    %112 = vector.broadcast %9 : vector<1x5xf32> to vector<32x5xf32>
    %113 = arith.addf %111, %112 : vector<32x5xf32>
    %cst_29 = arith.constant 0.000000e+00 : f32
    %114 = vector.broadcast %cst_29 : f32 to vector<32x5xf32>
    %115 = arith.cmpf oge, %113, %114 : vector<32x5xf32>
    %cst_30 = arith.constant 0.00999999977 : f32
    %116 = vector.broadcast %cst_30 : f32 to vector<32x5xf32>
    %117 = arith.mulf %116, %113 : vector<32x5xf32>
    %118 = arith.select %115, %113, %117 : vector<32x5xi1>, vector<32x5xf32>
    %cst_31 = arith.constant 2.000000e-01 : f32
    %119 = vector.broadcast %cst_31 : f32 to vector<1x5xf32>
    %120 = arith.truncf %119 : vector<1x5xf32> to vector<1x5xbf16>
    %121 = arith.truncf %118 : vector<32x5xf32> to vector<32x5xbf16>
    %cst_32 = arith.constant dense<0.000000e+00> : vector<1x32xf32>
    %122 = tpu.matmul %120, %121, %cst_32 {dimension_numbers = #tpu.dot_dimension_numbers<[1], [1], [0], [0], [0, 0, 1, 0], [], []>} : vector<1x5xbf16>, vector<32x5xbf16>, vector<1x32xf32> -> vector<1x32xf32>
    %c0_33 = arith.constant 0 : index
    %c0_34 = arith.constant 0 : index
    %123 = vector.load %arg3[%c0_33, %c0_34] : memref<1x32xf32, #tpu.memory_space<vmem>>, vector<1x32xf32>
    tpu.vector_store %arg3[%c0_33, %c0_34], %122 {strides = array<i32>} : memref<1x32xf32, #tpu.memory_space<vmem>>, vector<1x32xf32>,
    return
  }
}

</mosaic_0001>

<bundles_post_ra>
// kernel: smha_linear_classifier.1
= control target key start
LH: loop header
LB: loop body
LE: loop exit
PB: predicated region body
PF: predicated region fallthrough
CT: control target
= control target key end

     0   :  { %vm80_vm0 = vcmask 261120   ;;  %v2959_v18 = vmov 0.0   ;;  %vm2960_vm1 = vmmov 0   ;;  %s2962_s7 = smov 120   ;;  %s2963_s8 = smov 112   ;;  %vm204_vm2 = vcmask 64512   ;;  %s3562_s1 = inlined_call_operand.vmem [shape: bf16[149,32], index: 1, kind: input, shape index: {}]   ;;  %s3563_s0 = inlined_call_operand.vmem [shape: f32[32,32], index: 0, kind: input, shape index: {}]   ;;  %s3564_s2 = inlined_call_operand.vmem [shape: f32[12,96], index: 2, kind: input, shape index: {}]   ;;  %s3565_s3 = inlined_call_operand.vmem [shape: f32[1,32], index: 3, kind: output, shape index: {}]  }
   0x1   :  { %v2884_v0 = vld [vmem:[%s3562_s1] sm:$0xff]   ;;  %v2885_v1 = vld [vmem:[%s3562_s1 + $0x8] sm:$0xff]   ;;  %v2886_v6 = vld [vmem:[%s3562_s1 + $0x10] sm:$0xff]   ;;  %2642 = vmatprep.subr.bf16.mxu1 %v2959_v18  ;;  %2644 = vmatprep.mubr.msk.bf16.mxu1 %vm2960_vm1, %v2959_v18  ;;  %s2964_s9 = smov 104   ;;  %s2965_s10 = smov 64   ;;  %vm1168_vm3 = vcmask 1043456  }
   0x2   :  { %2862 = vmatprep.subr.msk.bf16.mxu0 %vm80_vm0, %v2884_v0  ;;  %v88_v2 = vsel %vm80_vm0, %v2884_v0, 0  ;;  %v40_v3 = vld [vmem:[%s3563_s0] sm:$0xff]  ;;  %v41_v4 = vld [vmem:[%s3563_s0 + $0x8] sm:$0xff]  ;;  %v91_v5 = vsel %vm80_vm0, %v2885_v1, 0  ;;  %v94_v8 = vsel %vm80_vm0, %v2886_v6, 0  ;;  %v2887_v9 = vld [vmem:[%s3562_s1 + $0x18] sm:$0xff]  }
   0x3   :  { %2627 = vmatpush3.bf16.xpose.msra.mxu0 %v88_v2  ;;  %v44_v7 = vpack.c.bf16 %v41_v4, %v40_v3  ;;  %v97_v10 = vsel %vm80_vm0, %v2887_v9, 0  ;;  %v2888_v11 = vld [vmem:[%s3562_s1 + $0x20] sm:$0xff]   ;;  %v2889_v13 = vld [vmem:[%s3562_s1 + $0x28] sm:$0xff]   ;;  %v42_v15 = vld [vmem:[%s3563_s0 + $0x10] sm:$0xff]  ;;  %s2966_s11 = smov 8   ;;  %s2967_s14 = smov 16  }
   0x4   :  { %2863 = vmatprep.subr.msk.bf16.mxu0 %vm80_vm0, %v2885_v1  ;;  %v100_v12 = vsel %vm80_vm0, %v2888_v11, 0  ;;  %v103_v14 = vsel %vm80_vm0, %v2889_v13, 0  ;;  %v43_v16 = vld [vmem:[%s3563_s0 + $0x18] sm:$0xff]  ;;  %v2449_v19 = vld [vmem:[%s3564_s2 + $0x8] ss:$0 sm:$0xff]  ;;  %s2961_s0 = smov 96  }
   0x5   :  { %2638 = vmatprep.mubr.msk.bf16.mxu0 %vm80_vm0, %v44_v7  ;;  %v45_v17 = vpack.c.bf16 %v43_v16, %v42_v15  ;;  %s2968_s17 = smov 24   ;;  %vm2006_vm4 = vcmask 130048   ;;  %vm2011_vm5 = vcmask 195584   ;;  %vm2393_vm14 = vcmask 39936  }
   0x6   :  { %vm2443_vm15 = vcmask 253952  }
   0xb   :  { %2629 = vmatpush3.bf16.xpose.msra.mxu0 %v91_v5 }
   0xc   :  { %2864 = vmatprep.subr.msk.bf16.mxu0 %vm80_vm0, %v2886_v6 }
  0x13   :  { %2631 = vmatpush3.bf16.xpose.msra.mxu0 %v94_v8 }
  0x14   :  { %2865 = vmatprep.subr.msk.bf16.mxu0 %vm80_vm0, %v2887_v9 }
  0x1b   :  { %2633 = vmatpush3.bf16.xpose.msra.mxu0 %v97_v10 }
  0x1c   :  { %2866 = vmatprep.subr.msk.bf16.mxu0 %vm80_vm0, %v2888_v11 }
  0x23   :  { %2635 = vmatpush3.bf16.xpose.msra.mxu0 %v100_v12 }
  0x24   :  { %2867 = vmatprep.subr.msk.bf16.mxu0 %vm80_vm0, %v2889_v13 }
  0x2b   :  { %2637 = vmatpush3.bf16.xpose.msra.mxu0 %v103_v14 }
  0x2c   :  { %2690 = vmatprep.subr.bf16.mxu0 %v2959_v18 }
  0x32   :  { %2639 = vmatmul.mubr.msk.bf16.vlgmr.msra.gmra.mrb[0].mxu0 %vm80_vm0, %v45_v17 }
  0x33   :  { %2692 = vmatprep.mubr.msk.bf16.mxu0 %vm2960_vm1, %v2959_v18 }
 0x105   :  { %v2640_v20 = vpop.f32.mrb[0].mxu0 }
 0x106   :  { %v139_v21 = vpop.f32.mrb[1].mxu0  ;;  %v148_v24 = vadd.f32 %v2640_v20, %v2449_v19 }
 0x107   :  { %v140_v22 = vadd.f32 %v2449_v19, %v139_v21  ;;  %v2641_v23 = vpop.f32.mrb[2].mxu0 }
 0x108   :  { %v151_v25 = vadd.f32 %v2641_v23, %v2449_v19  ;;  %v142_v26 = vpop.f32.mrb[3].mxu0  ;;  %v2531_v32 = vpack.c.bf16 %v148_v24, %v148_v24 }
 0x109   :  { %v3044_v27 = vpack.c.bf16 %v140_v22, %v140_v22  ;;  %v143_v28 = vadd.f32 %v2449_v19, %v142_v26 }
 0x10a   :  { %v155_v29 = vpack.c.bf16 %v151_v25, %v148_v24  ;;  %v2532_v33 = vpack.c.bf16 %v151_v25, %v151_v25 }
 0x10b   :  { %v154_v30 = vpack.c.bf16 %v143_v28, %v140_v22  ;;  %202 = vrot.lane.b32.xlu1 %v3044_v27, %s2961_s0  ;;  %v3048_v31 = vpack.c.bf16 %v143_v28, %v143_v28 }
 0x10d   :  { %158 = vrot.lane.b32.xlu0 %v154_v30, %s2962_s7 }
 0x10f   :  { %162 = vrot.lane.b32.xlu1 %v154_v30, %s2963_s8 }
 0x111   :  { %160 = vrot.lane.b32.xlu0 %v155_v29, %s2962_s7 }
 0x113   :  { %164 = vrot.lane.b32.xlu1 %v155_v29, %s2963_s8 }
 0x115   :  { %251 = vrot.lane.b32.xlu0 %v3048_v31, %s2961_s0 }
 0x117   :  { %166 = vrot.lane.b32.xlu1 %v154_v30, %s2964_s9 }
 0x119   :  { %299 = vrot.lane.b32.xlu0 %v2531_v32, %s2961_s0 }
 0x11b   :  { %168 = vrot.lane.b32.xlu1 %v155_v29, %s2964_s9 }
 0x11d   :  { %347 = vrot.lane.b32.xlu0 %v2532_v33, %s2961_s0 }
 0x17d   :  { %v203_v34 = vpop.permute.xlu1 %202 }
 0x17e   :  { %v209_v35 = vsel %vm204_vm2, %v203_v34, 0 }
 0x17f   :  { %2643 = vmatpush3.bf16.xpose.msra.mxu1 %v209_v35  ;;  %v159_v36 = vpop.permute.xlu0 %158 }
 0x180   :  { %v3055_v37 = vcombine.low %v159_v36, %v159_v36  ;;  %v3057_v38 = vcombine.high %v159_v36, %v159_v36  ;;  %2648 = vmatprep.subr.bf16.mxu1 %v2959_v18 }
 0x181   :  { %v163_v39 = vpop.permute.xlu1 %162 }
 0x182   :  { %443 = vrot.lane.b32.xlu1 %v3057_v38, %s2961_s0  ;;  %395 = vrot.lane.b32.xlu0 %v3055_v37, %s2961_s0  ;;  %v3076_v45 = vcombine.high %v163_v39, %v163_v39  ;;  %v3079_v47 = vcombine.low %v163_v39, %v163_v39 }
 0x183   :  { %v161_v40 = vpop.permute.xlu0 %160 }
 0x184   :  { %v3064_v41 = vcombine.low %v161_v40, %v161_v40  ;;  %v3066_v42 = vcombine.high %v161_v40, %v161_v40 }
 0x185   :  { %v165_v43 = vpop.permute.xlu1 %164 }
 0x186   :  { %2645 = vmatmul.mubr.msk.bf16.vlgmr.msra.gmra.mrb[0].mxu1 %vm204_vm2, %v3044_v27  ;;  %539 = vrot.lane.b32.xlu1 %v3066_v42, %s2961_s0  ;;  %v3086_v49 = vcombine.high %v165_v43, %v165_v43  ;;  %v3088_v50 = vcombine.low %v165_v43, %v165_v43 }
 0x187   :  { %491 = vrot.lane.b32.xlu0 %v3064_v41, %s2961_s0  ;;  %v252_v44 = vpop.permute.xlu0 %251  ;;  %2650 = vmatprep.mubr.msk.bf16.mxu1 %vm2960_vm1, %v2959_v18 }
 0x188   :  { %v257_v46 = vsel %vm204_vm2, %v252_v44, 0 }
 0x189   :  { %2649 = vmatpush3.bf16.xpose.msra.mxu1 %v257_v46  ;;  %v167_v48 = vpop.permute.xlu1 %166 }
 0x18a   :  { %635 = vrot.lane.b32.xlu1 %v3076_v45, %s2961_s0  ;;  %2654 = vmatprep.subr.bf16.mxu1 %v2959_v18  ;;  %v3094_v52 = vcombine.high %v167_v48, %v167_v48  ;;  %v3099_v54 = vcombine.low %v167_v48, %v167_v48 }
 0x18b   :  { %587 = vrot.lane.b32.xlu0 %v3079_v47, %s2961_s0  ;;  %v300_v51 = vpop.permute.xlu0 %299 }
 0x18c   :  { %v305_v53 = vsel %vm204_vm2, %v300_v51, 0 }
 0x18d   :  { %v169_v55 = vpop.permute.xlu1 %168 }
 0x18e   :  { %731 = vrot.lane.b32.xlu1 %v3086_v49, %s2961_s0  ;;  %v3108_v56 = vcombine.high %v169_v55, %v169_v55  ;;  %v3110_v57 = vcombine.low %v169_v55, %v169_v55 }
 0x18f   :  { %683 = vrot.lane.b32.xlu0 %v3088_v50, %s2961_s0  ;;  %v348_v58 = vpop.permute.xlu0 %347 }
 0x190   :  { %2651 = vmatmul.mubr.msk.bf16.vlgmr.msra.gmra.mrb[4].mxu1 %vm204_vm2, %v3048_v31  ;;  %v353_v59 = vsel %vm204_vm2, %v348_v58, 0 }
 0x191   :  { %2655 = vmatpush3.bf16.xpose.msra.mxu1 %v305_v53  ;;  %2656 = vmatprep.mubr.msk.bf16.mxu1 %vm2960_vm1, %v2959_v18 }
 0x192   :  { %827 = vrot.lane.b32.xlu1 %v3094_v52, %s2961_s0  ;;  %2660 = vmatprep.subr.bf16.mxu1 %v2959_v18 }
 0x193   :  { %779 = vrot.lane.b32.xlu0 %v3099_v54, %s2961_s0 }
 0x196   :  { %923 = vrot.lane.b32.xlu1 %v3108_v56, %s2961_s0 }
 0x197   :  { %875 = vrot.lane.b32.xlu0 %v3110_v57, %s2961_s0 }
 0x198   :  { %2657 = vmatmul.mubr.msk.bf16.vlgmr.msra.gmra.mrb[8].mxu1 %vm204_vm2, %v2531_v32 }
 0x199   :  { %2661 = vmatpush3.bf16.xpose.msra.mxu1 %v353_v59  ;;  %2662 = vmatprep.mubr.msk.bf16.mxu1 %vm2960_vm1, %v2959_v18 }
 0x19a   :  { %1163 = vrot.lane.b32.xlu1 %v3044_v27, %s2965_s10  ;;  %2666 = vmatprep.subr.bf16.mxu1 %v2959_v18 }
 0x19b   :  { %1212 = vrot.lane.b32.xlu0 %v3048_v31, %s2965_s10 }
 0x19e   :  { %1260 = vrot.lane.b32.xlu1 %v2531_v32, %s2965_s10 }
 0x19f   :  { %1308 = vrot.lane.b32.xlu0 %v2532_v33, %s2965_s10 }
 0x1a0   :  { %2663 = vmatmul.mubr.msk.bf16.vlgmr.msra.gmra.mrb[12].mxu1 %vm204_vm2, %v2532_v33 }
 0x1a1   :  { %2668 = vmatprep.mubr.msk.bf16.mxu1 %vm2960_vm1, %v2959_v18 }
 0x1a2   :  { %1452 = vrot.lane.b32.xlu1 %v3064_v41, %s2965_s10 }
 0x1a3   :  { %1500 = vrot.lane.b32.xlu0 %v3066_v42, %s2965_s10 }
 0x1a6   :  { %1356 = vrot.lane.b32.xlu1 %v3055_v37, %s2965_s10 }
 0x1a7   :  { %1404 = vrot.lane.b32.xlu0 %v3057_v38, %s2965_s10 }
 0x1aa   :  { %1548 = vrot.lane.b32.xlu1 %v3079_v47, %s2965_s10 }
 0x1f4   :  { %v396_v60 = vpop.permute.xlu0 %395  ;;  %v444_v62 = vpop.permute.xlu1 %443 }
 0x1f5   :  { %v401_v61 = vsel %vm204_vm2, %v396_v60, 0  ;;  %v449_v0 = vsel %vm204_vm2, %v444_v62, 0 }
 0x1f6   :  { %2667 = vmatpush3.bf16.xpose.msra.mxu1 %v401_v61 }
 0x1f7   :  { %2672 = vmatprep.subr.bf16.mxu1 %v2959_v18 }
 0x1f8   :  { %v540_v1 = vpop.permute.xlu1 %539 }
 0x1f9   :  { %v492_v63 = vpop.permute.xlu0 %491  ;;  %v545_v10 = vsel %vm204_vm2, %v540_v1, 0 }
 0x1fa   :  { %v497_v6 = vsel %vm204_vm2, %v492_v63, 0 }
 0x1fc   :  { %v636_v4 = vpop.permute.xlu1 %635 }
 0x1fd   :  { %v588_v2 = vpop.permute.xlu0 %587  ;;  %2669 = vmatmul.mubr.msk.bf16.vlgmr.msra.gmra.mrb[16].mxu1 %vm204_vm2, %v3055_v37  ;;  %v641_v14 = vsel %vm204_vm2, %v636_v4, 0 }
 0x1fe   :  { %v593_v3 = vsel %vm204_vm2, %v588_v2, 0  ;;  %2673 = vmatpush3.bf16.xpose.msra.mxu1 %v449_v0  ;;  %2674 = vmatprep.mubr.msk.bf16.mxu1 %vm2960_vm1, %v2959_v18 }
 0x1ff   :  { %2691 = vmatpush3.bf16.xpose.msra.mxu0 %v593_v3  ;;  %2678 = vmatprep.subr.bf16.mxu1 %v2959_v18 }
 0x200   :  { %2702 = vmatprep.subr.bf16.mxu0 %v2959_v18  ;;  %v732_v8 = vpop.permute.xlu1 %731 }
 0x201   :  { %v684_v5 = vpop.permute.xlu0 %683  ;;  %v737_v19 = vsel %vm204_vm2, %v732_v8, 0 }
 0x202   :  { %v689_v7 = vsel %vm204_vm2, %v684_v5, 0 }
 0x204   :  { %v828_v12 = vpop.permute.xlu1 %827 }
 0x205   :  { %2675 = vmatmul.mubr.msk.bf16.vlgmr.msra.gmra.mrb[20].mxu1 %vm204_vm2, %v3057_v38  ;;  %v780_v9 = vpop.permute.xlu0 %779  ;;  %v833_v21 = vsel %vm204_vm2, %v828_v12, 0 }
 0x206   :  { %2693 = vmatmul.mubr.msk.bf16.vlgmr.msra.gmra.mrb[4].mxu0 %vm204_vm2, %v3079_v47  ;;  %2679 = vmatpush3.bf16.xpose.msra.mxu1 %v497_v6  ;;  %v785_v11 = vsel %vm204_vm2, %v780_v9, 0 }
 0x207   :  { %2703 = vmatpush3.bf16.xpose.msra.mxu0 %v689_v7  ;;  %2680 = vmatprep.mubr.msk.bf16.mxu1 %vm2960_vm1, %v2959_v18 }
 0x208   :  { %2704 = vmatprep.mubr.msk.bf16.mxu0 %vm2960_vm1, %v2959_v18  ;;  %2684 = vmatprep.subr.bf16.mxu1 %v2959_v18  ;;  %v924_v15 = vpop.permute.xlu1 %923 }
 0x209   :  { %2714 = vmatprep.subr.bf16.mxu0 %v2959_v18  ;;  %v876_v13 = vpop.permute.xlu0 %875  ;;  %v929_v22 = vsel %vm204_vm2, %v924_v15, 0 }
 0x20a   :  { %v881_v16 = vsel %vm204_vm2, %v876_v13, 0 }
 0x20c   :  { %v1164_v17 = vpop.permute.xlu1 %1163 }
 0x20d   :  { %2681 = vmatmul.mubr.msk.bf16.vlgmr.msra.gmra.mrb[24].mxu1 %vm204_vm2, %v3064_v41  ;;  %v1170_v20 = vsel %vm1168_vm3, %v1164_v17, 0  ;;  %v1213_v23 = vpop.permute.xlu0 %1212 }
 0x20e   :  { %2705 = vmatmul.mubr.msk.bf16.vlgmr.msra.gmra.mrb[8].mxu0 %vm204_vm2, %v3088_v50  ;;  %2685 = vmatpush3.bf16.xpose.msra.mxu1 %v545_v10  ;;  %v1218_v24 = vsel %vm1168_vm3, %v1213_v23, 0 }
 0x20f   :  { %2715 = vmatpush3.bf16.xpose.msra.mxu0 %v785_v11  ;;  %2686 = vmatprep.mubr.msk.bf16.mxu1 %vm2960_vm1, %v2959_v18 }
 0x210   :  { %2716 = vmatprep.mubr.msk.bf16.mxu0 %vm2960_vm1, %v2959_v18  ;;  %2696 = vmatprep.subr.bf16.mxu1 %v2959_v18  ;;  %v3236_v55 = vpop.permute.xlu1 %1260 }
 0x211   :  { %2726 = vmatprep.subr.bf16.mxu0 %v2959_v18  ;;  %v3238_v58 = vpop.permute.xlu0 %1308 }
 0x214   :  { %v3250_v6 = vpop.permute.xlu1 %1452 }
 0x215   :  { %2687 = vmatmul.mubr.msk.bf16.vlgmr.msra.gmra.mrb[28].mxu1 %vm204_vm2, %v3066_v42  ;;  %v3248_v5 = vpop.permute.xlu0 %1500 }
 0x216   :  { %2717 = vmatmul.mubr.msk.bf16.vlgmr.msra.gmra.mrb[12].mxu0 %vm204_vm2, %v3099_v54  ;;  %2697 = vmatpush3.bf16.xpose.msra.mxu1 %v641_v14 }
 0x217   :  { %2727 = vmatpush3.bf16.xpose.msra.mxu0 %v881_v16  ;;  %2698 = vmatprep.mubr.msk.bf16.mxu1 %vm2960_vm1, %v2959_v18 }
 0x218   :  { %2728 = vmatprep.mubr.msk.bf16.mxu0 %vm2960_vm1, %v2959_v18  ;;  %2708 = vmatprep.subr.bf16.mxu1 %v2959_v18 }
 0x219   :  { %2738 = vmatprep.subr.bf16.mxu0 %v2959_v18  ;;  %v3258_v15 = vpop.permute.xlu0 %1404 }
 0x21d   :  { %2699 = vmatmul.mubr.msk.bf16.vlgmr.msra.gmra.mrb[32].mxu1 %vm204_vm2, %v3076_v45 }
 0x21e   :  { %2729 = vmatmul.mubr.msk.bf16.vlgmr.msra.gmra.mrb[16].mxu0 %vm204_vm2, %v3110_v57  ;;  %2709 = vmatpush3.bf16.xpose.msra.mxu1 %v737_v19  ;;  %v3262_v19 = vpop.permute.xlu1 %1356 }
 0x21f   :  { %2739 = vmatpush3.bf16.msra.mxu0 %v1170_v20  ;;  %2710 = vmatprep.mubr.msk.bf16.mxu1 %vm2960_vm1, %v2959_v18 }
 0x220   :  { %2720 = vmatprep.subr.bf16.mxu1 %v2959_v18  ;;  %2740 = vmatprep.mubr.msk.bf16.mxu0 %vm2960_vm1, %v2959_v18 }
 0x221   :  { %2750 = vmatprep.subr.bf16.mxu0 %v2959_v18 }
 0x225   :  { %2711 = vmatmul.mubr.msk.bf16.vlgmr.msra.gmra.mrb[36].mxu1 %vm204_vm2, %v3086_v49 }
 0x226   :  { %2721 = vmatpush3.bf16.xpose.msra.mxu1 %v833_v21  ;;  %2722 = vmatprep.mubr.msk.bf16.mxu1 %vm2960_vm1, %v2959_v18 }
 0x227   :  { %2732 = vmatprep.subr.bf16.mxu1 %v2959_v18 }
 0x22d   :  { %2723 = vmatmul.mubr.msk.bf16.vlgmr.msra.gmra.mrb[40].mxu1 %vm204_vm2, %v3094_v52 }
 0x22e   :  { %2733 = vmatpush3.bf16.xpose.msra.mxu1 %v929_v22  ;;  %2734 = vmatprep.mubr.msk.bf16.mxu1 %vm2960_vm1, %v2959_v18 }
 0x22f   :  { %2744 = vmatprep.subr.bf16.mxu1 %v2959_v18 }
 0x235   :  { %2735 = vmatmul.mubr.msk.bf16.vlgmr.msra.gmra.mrb[44].mxu1 %vm204_vm2, %v3108_v56 }
 0x236   :  { %2745 = vmatpush3.bf16.msra.mxu1 %v1218_v24  ;;  %2746 = vmatprep.mubr.msk.bf16.mxu1 %vm2960_vm1, %v2959_v18 }
 0x237   :  { %2756 = vmatprep.subr.bf16.mxu1 %v2959_v18 }
 0x259   :  { %v3216_v25 = vpop.f32.mrb[0].mxu1 }
 0x25a   :  { %v2646_v26 = vpop.f32.mrb[1].mxu1  ;;  %v971_v27 = vsel %vm204_vm2, %v3216_v25, -inf }
 0x25b   :  { %v248_v28 = vpop.f32.mrb[2].mxu1  ;;  %972 = vmax.xlane.f32.xlu0 %v971_v27 }
 0x25c   :  { %v2647_v29 = vpop.f32.mrb[3].mxu1 }
 0x263   :  { %v3220_v30 = vpop.f32.mrb[4].mxu1 }
 0x264   :  { %v2652_v31 = vpop.f32.mrb[5].mxu1  ;;  %v974_v32 = vsel %vm204_vm2, %v3220_v30, -inf }
 0x265   :  { %975 = vmax.xlane.f32.xlu1 %v974_v32  ;;  %v296_v33 = vpop.f32.mrb[6].mxu1 }
 0x266   :  { %v2653_v34 = vpop.f32.mrb[7].mxu1 }
 0x26b   :  { %v3224_v35 = vpop.f32.mrb[8].mxu1 }
 0x26c   :  { %v2658_v36 = vpop.f32.mrb[9].mxu1  ;;  %v977_v37 = vsel %vm204_vm2, %v3224_v35, -inf }
 0x26d   :  { %978 = vmax.xlane.f32.xlu0 %v977_v37  ;;  %v344_v38 = vpop.f32.mrb[10].mxu1  ;;  %v3273_v36 = vpop.permute.xlu1 %1548 }
 0x26e   :  { %v2659_v39 = vpop.f32.mrb[11].mxu1 }
 0x273   :  { %v3228_v40 = vpop.f32.mrb[12].mxu1 }
 0x274   :  { %v2664_v41 = vpop.f32.mrb[13].mxu1  ;;  %v980_v42 = vsel %vm204_vm2, %v3228_v40, -inf }
 0x275   :  { %981 = vmax.xlane.f32.xlu0 %v980_v42  ;;  %v392_v43 = vpop.f32.mrb[14].mxu1 }
 0x276   :  { %v2665_v44 = vpop.f32.mrb[15].mxu1 }
 0x2d0   :  { %v3232_v46 = vpop.f32.mrb[16].mxu1 }
 0x2d1   :  { %v2670_v47 = vpop.f32.mrb[17].mxu1  ;;  %v983_v48 = vsel %vm204_vm2, %v3232_v46, -inf }
 0x2d2   :  { %984 = vmax.xlane.f32.xlu1 %v983_v48  ;;  %v440_v51 = vpop.f32.mrb[18].mxu1 }
 0x2d3   :  { %v2671_v53 = vpop.f32.mrb[19].mxu1 }
 0x2d8   :  { %v3240_v59 = vpop.f32.mrb[20].mxu1 }
 0x2d9   :  { %v3242_v60 = vpop.f32.mrb[4].mxu0  ;;  %v2676_v61 = vpop.f32.mrb[21].mxu1  ;;  %v986_v62 = vsel %vm204_vm2, %v3240_v59, -inf }
 0x2da   :  { %v2694_v63 = vpop.f32.mrb[5].mxu0  ;;  %987 = vmax.xlane.f32.xlu0 %v986_v62  ;;  %v488_v0 = vpop.f32.mrb[22].mxu1  ;;  %v995_v1 = vsel %vm204_vm2, %v3242_v60, -inf }
 0x2db   :  { %996 = vmax.xlane.f32.xlu1 %v995_v1  ;;  %v632_v2 = vpop.f32.mrb[6].mxu0  ;;  %v2677_v3 = vpop.f32.mrb[23].mxu1 }
 0x2dc   :  { %v2695_v4 = vpop.f32.mrb[7].mxu0 }
 0x2e0   :  { %v3252_v7 = vpop.f32.mrb[24].mxu1 }
 0x2e1   :  { %v3254_v8 = vpop.f32.mrb[8].mxu0  ;;  %v2682_v9 = vpop.f32.mrb[25].mxu1  ;;  %v989_v17 = vsel %vm204_vm2, %v3252_v7, -inf }
 0x2e2   :  { %v2706_v10 = vpop.f32.mrb[9].mxu0  ;;  %v536_v11 = vpop.f32.mrb[26].mxu1  ;;  %v1001_v12 = vsel %vm204_vm2, %v3254_v8, -inf }
 0x2e3   :  { %1002 = vmax.xlane.f32.xlu1 %v1001_v12  ;;  %v728_v13 = vpop.f32.mrb[10].mxu0  ;;  %v2683_v14 = vpop.f32.mrb[27].mxu1 }
 0x2e4   :  { %v2707_v16 = vpop.f32.mrb[11].mxu0 }
 0x2e7   :  { %990 = vmax.xlane.f32.xlu1 %v989_v17 }
 0x2e8   :  { %v3264_v20 = vpop.f32.mrb[28].mxu1  ;;  %v973_v21 = vpop.xlane.xlu0 %972 }
 0x2e9   :  { %v3266_v22 = vpop.f32.mrb[12].mxu0  ;;  %v1019_v23 = vsub.f32 %v3216_v25, %v973_v21  ;;  %v2688_v24 = vpop.f32.mrb[29].mxu1  ;;  %v992_v26 = vsel %vm204_vm2, %v3264_v20, -inf }
 0x2ea   :  { %v2718_v27 = vpop.f32.mrb[13].mxu0  ;;  %993 = vmax.xlane.f32.xlu0 %v992_v26  ;;  %v584_v28 = vpop.f32.mrb[30].mxu1  ;;  %v1007_v29 = vsel %vm204_vm2, %v3266_v22, -inf }
 0x2eb   :  { %v1035_v31 = vmul.f32 1.442695, %v1019_v23  ;;  %1008 = vmax.xlane.f32.xlu1 %v1007_v29  ;;  %v824_v32 = vpop.f32.mrb[14].mxu0  ;;  %v2689_v33 = vpop.f32.mrb[31].mxu1 }
 0x2ec   :  { %v2719_v34 = vpop.f32.mrb[15].mxu0 }
 0x2ed   :  { %2893 = vpow2.f32 %v1035_v31 }
 0x2f0   :  { %v3275_v37 = vpop.f32.mrb[32].mxu1 }
 0x2f1   :  { %v3277_v25 = vpop.f32.mrb[16].mxu0  ;;  %v2700_v38 = vpop.f32.mrb[33].mxu1  ;;  %v998_v39 = vsel %vm204_vm2, %v3275_v37, -inf }
 0x2f2   :  { %v2730_v41 = vpop.f32.mrb[17].mxu0  ;;  %v976_v42 = vpop.xlane.xlu1 %975  ;;  %999 = vmax.xlane.f32.xlu0 %v998_v39  ;;  %v1013_v43 = vsel %vm204_vm2, %v3277_v25, -inf }
 0x2f3   :  { %v1020_v44 = vsub.f32 %v3220_v30, %v976_v42  ;;  %v680_v47 = vpop.f32.mrb[34].mxu1  ;;  %1014 = vmax.xlane.f32.xlu1 %v1013_v43  ;;  %v920_v48 = vpop.f32.mrb[18].mxu0 }
 0x2f4   :  { %v2701_v51 = vpop.f32.mrb[35].mxu1  ;;  %v2731_v53 = vpop.f32.mrb[19].mxu0 }
 0x2f5   :  { %v1037_v61 = vmul.f32 1.442695, %v1020_v44 }
 0x2f7   :  { %v3284_v62 = vpop.eup %2893  ;;  %2895 = vpow2.f32 %v1037_v61 }
 0x2f8   :  { %v3286_v63 = vpop.f32.mrb[36].mxu1  ;;  %v1067_v0 = vsel %vm204_vm2, %v3284_v62, 0.0 }
 0x2f9   :  { %v2712_v1 = vpop.f32.mrb[37].mxu1  ;;  %1068 = vadd.xlane.f32.xlu1 %v1067_v0  ;;  %v1004_v2 = vsel %vm204_vm2, %v3286_v63, -inf }
 0x2fa   :  { %1005 = vmax.xlane.f32.xlu0 %v1004_v2  ;;  %v776_v30 = vpop.f32.mrb[38].mxu1  ;;  %v979_v3 = vpop.xlane.xlu0 %978 }
 0x2fb   :  { %v1021_v4 = vsub.f32 %v3224_v35, %v979_v3  ;;  %v2713_v9 = vpop.f32.mrb[39].mxu1 }
 0x2fd   :  { %v1039_v10 = vmul.f32 1.442695, %v1021_v4 }
 0x2ff   :  { %2897 = vpow2.f32 %v1039_v10 }
 0x300   :  { %v3293_v11 = vpop.f32.mrb[40].mxu1 }
 0x301   :  { %v3295_v12 = vpop.eup %2895  ;;  %v2724_v13 = vpop.f32.mrb[41].mxu1  ;;  %v1010_v21 = vsel %vm204_vm2, %v3293_v11, -inf }
 0x302   :  { %v872_v14 = vpop.f32.mrb[42].mxu1  ;;  %v1070_v16 = vsel %vm204_vm2, %v3295_v12, 0.0  ;;  %v982_v31 = vpop.xlane.xlu0 %981 }
 0x303   :  { %1071 = vadd.xlane.f32.xlu0 %v1070_v16  ;;  %v2725_v17 = vpop.f32.mrb[43].mxu1  ;;  %v1022_v32 = vsub.f32 %v3228_v40, %v982_v31 }
 0x305   :  { %v1041_v33 = vmul.f32 1.442695, %v1022_v32 }
 0x307   :  { %1011 = vmax.xlane.f32.xlu0 %v1010_v21  ;;  %2899 = vpow2.f32 %v1041_v33 }
 0x308   :  { %v3301_v23 = vpop.f32.mrb[44].mxu1 }
 0x309   :  { %v3303_v35 = vpop.eup %2897  ;;  %v2736_v24 = vpop.f32.mrb[45].mxu1  ;;  %v1016_v26 = vsel %vm204_vm2, %v3301_v23, -inf }
 0x30a   :  { %v968_v27 = vpop.f32.mrb[46].mxu1  ;;  %v1073_v28 = vsel %vm204_vm2, %v3303_v35, 0.0 }
 0x30b   :  { %1017 = vmax.xlane.f32.xlu0 %v1016_v26  ;;  %v2737_v29 = vpop.f32.mrb[47].mxu1  ;;  %1074 = vadd.xlane.f32.xlu1 %v1073_v28 }
 0x311   :  { %v3314_v34 = vpop.eup %2899 }
 0x312   :  { %v1076_v38 = vsel %vm204_vm2, %v3314_v34, 0.0 }
 0x31c   :  { %1644 = vrot.lane.b32.xlu1 %v3088_v50, %s2965_s10 }
 0x321   :  { %1596 = vrot.lane.b32.xlu0 %v3076_v45, %s2965_s10 }
 0x340   :  { %1077 = vadd.xlane.f32.xlu0 %v1076_v38 }
 0x35f   :  { %v985_v39 = vpop.xlane.xlu1 %984 }
 0x360   :  { %v1023_v41 = vsub.f32 %v3232_v46, %v985_v39 }
 0x362   :  { %v1043_v42 = vmul.f32 1.442695, %v1023_v41 }
 0x364   :  { %2901 = vpow2.f32 %v1043_v42 }
 0x367   :  { %v988_v50 = vpop.xlane.xlu0 %987 }
 0x368   :  { %v997_v43 = vpop.xlane.xlu1 %996  ;;  %v1024_v45 = vsub.f32 %v3240_v59, %v988_v50 }
 0x369   :  { %v1027_v44 = vsub.f32 %v3242_v60, %v997_v43 }
 0x36a   :  { %v1045_v40 = vmul.f32 1.442695, %v1024_v45 }
 0x36b   :  { %v1051_v47 = vmul.f32 1.442695, %v1027_v44 }
 0x36c   :  { %2903 = vpow2.f32 %v1045_v40 }
 0x36d   :  { %2905 = vpow2.f32 %v1051_v47 }
 0x36e   :  { %v3321_v48 = vpop.eup %2901 }
 0x36f   :  { %v1079_v51 = vsel %vm204_vm2, %v3321_v48, 0.0 }
 0x370   :  { %v1003_v53 = vpop.xlane.xlu1 %1002  ;;  %1080 = vadd.xlane.f32.xlu1 %v1079_v51 }
 0x371   :  { %v1029_v46 = vsub.f32 %v3254_v8, %v1003_v53 }
 0x373   :  { %v1055_v61 = vmul.f32 1.442695, %v1029_v46 }
 0x374   :  { %v991_v0 = vpop.xlane.xlu1 %990 }
 0x375   :  { %2907 = vpow2.f32 %v1055_v61  ;;  %v1025_v59 = vsub.f32 %v3252_v7, %v991_v0 }
 0x376   :  { %v3327_v1 = vpop.eup %2903 }
 0x377   :  { %v3329_v60 = vpop.eup %2905  ;;  %v1047_v2 = vmul.f32 1.442695, %v1025_v59  ;;  %v994_v30 = vpop.xlane.xlu0 %993  ;;  %v1082_v3 = vsel %vm204_vm2, %v3327_v1, 0.0 }
 0x378   :  { %v1026_v4 = vsub.f32 %v3264_v20, %v994_v30  ;;  %v1091_v9 = vsel %vm204_vm2, %v3329_v60, 0.0  ;;  %1083 = vadd.xlane.f32.xlu0 %v1082_v3  ;;  %v1009_v7 = vpop.xlane.xlu1 %1008 }
 0x379   :  { %2909 = vpow2.f32 %v1047_v2  ;;  %1092 = vadd.xlane.f32.xlu1 %v1091_v9  ;;  %v1031_v47 = vsub.f32 %v3266_v22, %v1009_v7 }
 0x37a   :  { %v1049_v8 = vmul.f32 1.442695, %v1026_v4 }
 0x37b   :  { %v1059_v46 = vmul.f32 1.442695, %v1031_v47 }
 0x37c   :  { %2911 = vpow2.f32 %v1049_v8 }
 0x37f   :  { %v3336_v10 = vpop.eup %2907  ;;  %v1000_v13 = vpop.xlane.xlu0 %999 }
 0x380   :  { %v1028_v14 = vsub.f32 %v3275_v37, %v1000_v13  ;;  %v1097_v16 = vsel %vm204_vm2, %v3336_v10, 0.0  ;;  %v1015_v17 = vpop.xlane.xlu1 %1014 }
 0x381   :  { %1098 = vadd.xlane.f32.xlu1 %v1097_v16 }
 0x382   :  { %v1053_v20 = vmul.f32 1.442695, %v1028_v14 }
 0x383   :  { %v3341_v21 = vpop.eup %2909 }
 0x384   :  { %2913 = vpow2.f32 %v1053_v20  ;;  %v1085_v24 = vsel %vm204_vm2, %v3341_v21, 0.0 }
 0x385   :  { %1086 = vadd.xlane.f32.xlu1 %v1085_v24 }
 0x386   :  { %v3345_v26 = vpop.eup %2911  ;;  %v1069_v27 = vpop.xlane.xlu1 %1068 }
 0x387   :  { %2915 = vrcp.f32 %v1069_v27  ;;  %v1006_v28 = vpop.xlane.xlu0 %1005  ;;  %v1088_v37 = vsel %vm204_vm2, %v3345_v26, 0.0 }
 0x388   :  { %v1030_v29 = vsub.f32 %v3286_v63, %v1006_v28  ;;  %1089 = vadd.xlane.f32.xlu0 %v1088_v37  ;;  %v1266_v63 = vsel %vm1168_vm3, %v3236_v55, 0  ;;  %v1458_v28 = vsel %vm1168_vm3, %v3250_v6, 0 }
 0x38a   :  { %v1057_v31 = vmul.f32 1.442695, %v1030_v29 }
 0x38c   :  { %2917 = vpow2.f32 %v1057_v31 }
 0x38e   :  { %v3350_v32 = vpop.eup %2913 }
 0x38f   :  { %v1094_v33 = vsel %vm204_vm2, %v3350_v32, 0.0 }
 0x390   :  { %1095 = vadd.xlane.f32.xlu0 %v1094_v33  ;;  %v1072_v38 = vpop.xlane.xlu0 %1071  ;;  %v1506_v33 = vsel %vm1168_vm3, %v3248_v5, 0 }
 0x391   :  { %v2916_v39 = vpop.eup %2915  ;;  %2919 = vrcp.f32 %v1072_v38 }
 0x392   :  { %v1131_v41 = vmul.f32 %v2916_v39, %v3284_v62 }
 0x394   :  { %v1147_v42 = vpack.c.bf16 %v1131_v41, %v1131_v41  ;;  %v1012_v22 = vpop.xlane.xlu0 %1011 }
 0x396   :  { %v3355_v50 = vpop.eup %2917  ;;  %1692 = vrot.lane.b32.xlu1 %v3086_v49, %s2965_s10  ;;  %2741 = vmatmul.mubr.msk.bf16.vlgmr.msra.gmra.mrb[20].mxu0 %vm204_vm2, %v1147_v42  ;;  %v1314_v49 = vsel %vm1168_vm3, %v3238_v58, 0  ;;  %v1362_v58 = vsel %vm1168_vm3, %v3262_v19, 0 }
 0x397   :  { %2751 = vmatpush3.bf16.msra.mxu0 %v1266_v63  ;;  %v1100_v43 = vsel %vm204_vm2, %v3355_v50, 0.0  ;;  %2752 = vmatprep.mubr.msk.bf16.mxu0 %vm2960_vm1, %v2959_v18 }
 0x398   :  { %v1075_v45 = vpop.xlane.xlu1 %1074  ;;  %1101 = vadd.xlane.f32.xlu0 %v1100_v43  ;;  %2762 = vmatprep.subr.bf16.mxu0 %v2959_v18  ;;  %v1018_v19 = vpop.xlane.xlu0 %1017  ;;  %v1554_v43 = vsel %vm1168_vm3, %v3273_v36, 0 }
 0x399   :  { %2921 = vrcp.f32 %v1075_v45  ;;  %v1034_v30 = vsub.f32 %v3301_v23, %v1018_v19 }
 0x39a   :  { %2923 = vpow2.f32 %v1059_v46 }
 0x39b   :  { %v2920_v62 = vpop.eup %2919 }
 0x39c   :  { %v1132_v55 = vmul.f32 %v2920_v62, %v3295_v12  ;;  %v1033_v12 = vsub.f32 %v3277_v25, %v1015_v17  ;;  %v1032_v25 = vsub.f32 %v3293_v11, %v1012_v22  ;;  %v3397_v11 = vpop.permute.xlu0 %1596  ;;  %v1410_v17 = vsel %vm1168_vm3, %v3258_v15, 0 }
 0x39e   :  { %v1148_v44 = vpack.c.bf16 %v1132_v55, %v1132_v55  ;;  %v1063_v61 = vmul.f32 1.442695, %v1033_v12  ;;  %v1061_v2 = vmul.f32 1.442695, %v1032_v25 }
 0x3a0   :  { %2747 = vmatmul.mubr.msk.bf16.vlgmr.msra.gmra.mrb[48].mxu1 %vm204_vm2, %v1148_v44  ;;  %2925 = vpow2.f32 %v1063_v61 }
 0x3a1   :  { %2757 = vmatpush3.bf16.msra.mxu1 %v1314_v49  ;;  %2758 = vmatprep.mubr.msk.bf16.mxu1 %vm2960_vm1, %v2959_v18  ;;  %2927 = vpow2.f32 %v1061_v2 }
 0x3a2   :  { %2768 = vmatprep.subr.bf16.mxu1 %v2959_v18 }
 0x3a3   :  { %v2922_v40 = vpop.eup %2921 }
 0x3a4   :  { %v1133_v51 = vmul.f32 %v2922_v40, %v3303_v35  ;;  %v3385_v35 = vpop.eup %2923 }
 0x3a5   :  { %v1103_v0 = vsel %vm204_vm2, %v3385_v35, 0.0 }
 0x3a6   :  { %v1149_v53 = vpack.c.bf16 %v1133_v51, %v1133_v51 }
 0x3a8   :  { %2753 = vmatmul.mubr.msk.bf16.vlgmr.msra.gmra.mrb[24].mxu0 %vm204_vm2, %v1149_v53 }
 0x3a9   :  { %2763 = vmatpush3.bf16.msra.mxu0 %v1362_v58  ;;  %2764 = vmatprep.mubr.msk.bf16.mxu0 %vm2960_vm1, %v2959_v18 }
 0x3aa   :  { %2774 = vmatprep.subr.bf16.mxu0 %v2959_v18  ;;  %v3390_v59 = vpop.eup %2925 }
 0x3ab   :  { %v1109_v3 = vsel %vm204_vm2, %v3390_v59, 0.0  ;;  %v3395_v4 = vpop.eup %2927 }
 0x3ac   :  { %v1106_v9 = vsel %vm204_vm2, %v3395_v4, 0.0 }
 0x3ae   :  { %1740 = vrot.lane.b32.xlu0 %v3099_v54, %s2965_s10  ;;  %v1065_v54 = vmul.f32 1.442695, %v1034_v30 }
 0x3b0   :  { %2929 = vpow2.f32 %v1065_v54 }
 0x3ba   :  { %1104 = vadd.xlane.f32.xlu1 %v1103_v0  ;;  %v3401_v8 = vpop.eup %2929 }
 0x3bb   :  { %v1112_v23 = vsel %vm204_vm2, %v3401_v8, 0.0 }
 0x3be   :  { %1110 = vadd.xlane.f32.xlu1 %v1109_v3 }
 0x3cd   :  { %1107 = vadd.xlane.f32.xlu0 %v1106_v9  ;;  %v1078_v7 = vpop.xlane.xlu0 %1077 }
 0x3ce   :  { %2931 = vrcp.f32 %v1078_v7 }
 0x3cf   :  { %1788 = vrot.lane.b32.xlu1 %v3094_v52, %s2965_s10  ;;  %v1645_v52 = vpop.permute.xlu1 %1644 }
 0x3d0   :  { %v1650_v49 = vsel %vm1168_vm3, %v1645_v52, 0 }
 0x3d1   :  { %1113 = vadd.xlane.f32.xlu0 %v1112_v23 }
 0x3d3   :  { %1884 = vrot.lane.b32.xlu1 %v3108_v56, %s2965_s10 }
 0x3d8   :  { %v2932_v13 = vpop.eup %2931 }
 0x3d9   :  { %v1134_v14 = vmul.f32 %v2932_v13, %v3314_v34 }
 0x3db   :  { %v1150_v16 = vpack.c.bf16 %v1134_v14, %v1134_v14 }
 0x3dd   :  { %2759 = vmatmul.mubr.msk.bf16.vlgmr.msra.gmra.mrb[52].mxu1 %vm204_vm2, %v1150_v16 }
 0x3de   :  { %2769 = vmatpush3.bf16.msra.mxu1 %v1410_v17  ;;  %2770 = vmatprep.mubr.msk.bf16.mxu1 %vm2960_vm1, %v2959_v18 }
 0x3df   :  { %2780 = vmatprep.subr.bf16.mxu1 %v2959_v18 }
 0x3e7   :  { %1836 = vrot.lane.b32.xlu0 %v3110_v57, %s2965_s10 }
 0x3fd   :  { %v1081_v56 = vpop.xlane.xlu1 %1080 }
 0x3fe   :  { %2933 = vrcp.f32 %v1081_v56 }
 0x405   :  { %v1084_v20 = vpop.xlane.xlu0 %1083 }
 0x406   :  { %2935 = vrcp.f32 %v1084_v20  ;;  %v1093_v15 = vpop.xlane.xlu1 %1092 }
 0x408   :  { %v2934_v34 = vpop.eup %2933 }
 0x409   :  { %v1135_v24 = vmul.f32 %v2934_v34, %v3321_v48 }
 0x40b   :  { %v1151_v27 = vpack.c.bf16 %v1135_v24, %v1135_v24 }
 0x40d   :  { %2765 = vmatmul.mubr.msk.bf16.vlgmr.msra.gmra.mrb[28].mxu0 %vm204_vm2, %v1151_v27 }
 0x40e   :  { %2775 = vmatpush3.bf16.msra.mxu0 %v1458_v28  ;;  %v1099_v37 = vpop.xlane.xlu1 %1098  ;;  %2776 = vmatprep.mubr.msk.bf16.mxu0 %vm2960_vm1, %v2959_v18 }
 0x40f   :  { %2786 = vmatprep.subr.bf16.mxu0 %v2959_v18 }
 0x410   :  { %v2936_v57 = vpop.eup %2935 }
 0x411   :  { %v1136_v29 = vmul.f32 %v2936_v57, %v3327_v1 }
 0x412   :  { %v1087_v31 = vpop.xlane.xlu1 %1086 }
 0x413   :  { %2937 = vrcp.f32 %v1087_v31  ;;  %v1152_v48 = vpack.c.bf16 %v1136_v29, %v1136_v29 }
 0x415   :  { %2771 = vmatmul.mubr.msk.bf16.vlgmr.msra.gmra.mrb[56].mxu1 %vm204_vm2, %v1152_v48  ;;  %v1090_v6 = vpop.xlane.xlu0 %1089 }
 0x416   :  { %2781 = vmatpush3.bf16.msra.mxu1 %v1506_v33  ;;  %2939 = vrcp.f32 %v1090_v6  ;;  %2782 = vmatprep.mubr.msk.bf16.mxu1 %vm2960_vm1, %v2959_v18  ;;  %v1693_v40 = vpop.permute.xlu1 %1692 }
 0x417   :  { %2941 = vrcp.f32 %v1093_v15  ;;  %2792 = vmatprep.subr.bf16.mxu1 %v2959_v18  ;;  %v1698_v53 = vsel %vm1168_vm3, %v1693_v40, 0 }
 0x41d   :  { %v2938_v38 = vpop.eup %2937  ;;  %v1096_v39 = vpop.xlane.xlu0 %1095 }
 0x41e   :  { %v1137_v1 = vmul.f32 %v2938_v38, %v3341_v21  ;;  %2943 = vrcp.f32 %v1096_v39  ;;  %v1602_v21 = vsel %vm1168_vm3, %v3397_v11, 0 }
 0x41f   :  { %2945 = vrcp.f32 %v1099_v37 }
 0x420   :  { %v2940_v41 = vpop.eup %2939  ;;  %v1153_v42 = vpack.c.bf16 %v1137_v1, %v1137_v1 }
 0x421   :  { %v2942_v5 = vpop.eup %2941  ;;  %v1138_v63 = vmul.f32 %v2940_v41, %v3345_v26 }
 0x422   :  { %2777 = vmatmul.mubr.msk.bf16.vlgmr.msra.gmra.mrb[32].mxu0 %vm204_vm2, %v1153_v42  ;;  %v1139_v62 = vmul.f32 %v2942_v5, %v3329_v60 }
 0x423   :  { %2787 = vmatpush3.bf16.msra.mxu0 %v1554_v43  ;;  %v1154_v45 = vpack.c.bf16 %v1138_v63, %v1138_v63  ;;  %2788 = vmatprep.mubr.msk.bf16.mxu0 %vm2960_vm1, %v2959_v18 }
 0x424   :  { %2798 = vmatprep.subr.bf16.mxu0 %v2959_v18  ;;  %v1155_v55 = vpack.c.bf16 %v1139_v62, %v1139_v62 }
 0x425   :  { %2783 = vmatmul.mubr.msk.bf16.vlgmr.msra.gmra.mrb[60].mxu1 %vm204_vm2, %v1154_v45  ;;  %v1102_v26 = vpop.xlane.xlu0 %1101 }
 0x426   :  { %2793 = vmatpush3.bf16.msra.mxu1 %v1602_v21  ;;  %2947 = vrcp.f32 %v1102_v26  ;;  %2794 = vmatprep.mubr.msk.bf16.mxu1 %vm2960_vm1, %v2959_v18 }
 0x427   :  { %2804 = vmatprep.subr.bf16.mxu1 %v2959_v18 }
 0x428   :  { %v2944_v36 = vpop.eup %2943 }
 0x429   :  { %v2946_v44 = vpop.eup %2945  ;;  %v1140_v60 = vmul.f32 %v2944_v36, %v3350_v32  ;;  %v1741_v32 = vpop.permute.xlu0 %1740 }
 0x42a   :  { %2789 = vmatmul.mubr.msk.bf16.vlgmr.msra.gmra.mrb[36].mxu0 %vm204_vm2, %v1155_v55  ;;  %v1141_v51 = vmul.f32 %v2946_v44, %v3336_v10  ;;  %v1746_v61 = vsel %vm1168_vm3, %v1741_v32, 0 }
 0x42b   :  { %2799 = vmatpush3.bf16.msra.mxu0 %v1650_v49  ;;  %v1156_v47 = vpack.c.bf16 %v1140_v60, %v1140_v60  ;;  %2800 = vmatprep.mubr.msk.bf16.mxu0 %vm2960_vm1, %v2959_v18 }
 0x42c   :  { %2810 = vmatprep.subr.bf16.mxu0 %v2959_v18  ;;  %v1157_v12 = vpack.c.bf16 %v1141_v51, %v1141_v51 }
 0x42d   :  { %2795 = vmatmul.mubr.msk.bf16.vlgmr.msra.gmra.mrb[64].mxu1 %vm204_vm2, %v1156_v47 }
 0x42e   :  { %2805 = vmatpush3.bf16.msra.mxu1 %v1698_v53  ;;  %2806 = vmatprep.mubr.msk.bf16.mxu1 %vm2960_vm1, %v2959_v18 }
 0x42f   :  { %2816 = vmatprep.subr.bf16.mxu1 %v2959_v18 }
 0x430   :  { %v2948_v46 = vpop.eup %2947 }
 0x431   :  { %v1142_v58 = vmul.f32 %v2948_v46, %v3355_v50 }
 0x432   :  { %2801 = vmatmul.mubr.msk.bf16.vlgmr.msra.gmra.mrb[40].mxu0 %vm204_vm2, %v1157_v12 }
 0x433   :  { %2811 = vmatpush3.bf16.msra.mxu0 %v1746_v61  ;;  %v1158_v10 = vpack.c.bf16 %v1142_v58, %v1142_v58  ;;  %2812 = vmatprep.mubr.msk.bf16.mxu0 %vm2960_vm1, %v2959_v18  ;;  %v2890_v58 = vld [vmem:[%s3562_s1 + $0x30] sm:$0xff]  }
 0x434   :  { %2822 = vmatprep.subr.bf16.mxu0 %v2959_v18 }
 0x435   :  { %2807 = vmatmul.mubr.msk.bf16.vlgmr.msra.gmra.mrb[68].mxu1 %vm204_vm2, %v1158_v10 }
 0x436   :  { %2818 = vmatprep.mubr.msk.bf16.mxu1 %vm2960_vm1, %v2959_v18 }
 0x447   :  { %v1105_v22 = vpop.xlane.xlu1 %1104 }
 0x448   :  { %2949 = vrcp.f32 %v1105_v22 }
 0x44b   :  { %v1111_v25 = vpop.xlane.xlu1 %1110 }
 0x44c   :  { %2951 = vrcp.f32 %v1111_v25  ;;  %v2035_v25 = vsel %vm80_vm0, %v2890_v58, 0 }
 0x44f   :  { %v1789_v50 = vpop.permute.xlu1 %1788 }
 0x450   :  { %v1794_v19 = vsel %vm1168_vm3, %v1789_v50, 0 }
 0x451   :  { %2817 = vmatpush3.bf16.msra.mxu1 %v1794_v19 }
 0x452   :  { %v2950_v0 = vpop.eup %2949  ;;  %2828 = vmatprep.subr.bf16.mxu1 %v2959_v18 }
 0x453   :  { %v1143_v2 = vmul.f32 %v2950_v0, %v3385_v35  ;;  %v1885_v16 = vpop.permute.xlu1 %1884 }
 0x454   :  { %v1890_v20 = vsel %vm1168_vm3, %v1885_v16, 0 }
 0x455   :  { %v1159_v30 = vpack.c.bf16 %v1143_v2, %v1143_v2 }
 0x456   :  { %v2952_v54 = vpop.eup %2951 }
 0x457   :  { %2813 = vmatmul.mubr.msk.bf16.vlgmr.msra.gmra.mrb[44].mxu0 %vm204_vm2, %v1159_v30  ;;  %v1145_v9 = vmul.f32 %v2952_v54, %v3390_v59 }
 0x458   :  { %2824 = vmatprep.mubr.msk.bf16.mxu0 %vm2960_vm1, %v2959_v18 }
 0x459   :  { %v1161_v35 = vpack.c.bf16 %v1145_v9, %v1145_v9 }
 0x45a   :  { %v1108_v3 = vpop.xlane.xlu0 %1107 }
 0x45b   :  { %2953 = vrcp.f32 %v1108_v3 }
 0x45e   :  { %v1114_v11 = vpop.xlane.xlu0 %1113 }
 0x45f   :  { %2955 = vrcp.f32 %v1114_v11 }
 0x462   :  { %v1837_v7 = vpop.permute.xlu0 %1836 }
 0x463   :  { %v1842_v23 = vsel %vm1168_vm3, %v1837_v7, 0 }
 0x464   :  { %2823 = vmatpush3.bf16.msra.mxu0 %v1842_v23 }
 0x465   :  { %v2954_v13 = vpop.eup %2953  ;;  %2868 = vmatprep.subr.msk.bf16.mxu0 %vm80_vm0, %v2890_v58 }
 0x466   :  { %v1144_v14 = vmul.f32 %v2954_v13, %v3395_v4 }
 0x467   :  { %2825 = vmatmul.mubr.msk.bf16.vlgmr.msra.gmra.mrb[48].mxu0 %vm204_vm2, %v1161_v35 }
 0x468   :  { %v1160_v17 = vpack.c.bf16 %v1144_v14, %v1144_v14 }
 0x469   :  { %v2956_v52 = vpop.eup %2955  ;;  %v3478_v56 = vpop.f32.mrb[20].mxu0 }
 0x46a   :  { %v2742_v34 = vpop.f32.mrb[21].mxu0  ;;  %2819 = vmatmul.mubr.msk.bf16.vlgmr.msra.gmra.mrb[72].mxu1 %vm204_vm2, %v1160_v17  ;;  %v1146_v24 = vmul.f32 %v2956_v52, %v3401_v8 }
 0x46b   :  { %2829 = vmatpush3.bf16.msra.mxu1 %v1890_v20  ;;  %v1209_v59 = vpop.f32.mrb[22].mxu0  ;;  %2830 = vmatprep.mubr.msk.bf16.mxu1 %vm2960_vm1, %v2959_v18  ;;  %v2891_v20 = vld [vmem:[%s3562_s1 + $0x38] sm:$0xff]  }
 0x46c   :  { %v2743_v4 = vpop.f32.mrb[23].mxu0  ;;  %v1162_v15 = vpack.c.bf16 %v1146_v24, %v1146_v24  ;;  %v2038_v34 = vsel %vm80_vm0, %v2891_v20, 0 }
 0x46d   :  { %2835 = vmatpush3.bf16.xpose.msra.mxu0 %v2035_v25 }
 0x46e   :  { %2869 = vmatprep.subr.msk.bf16.mxu0 %vm80_vm0, %v2891_v20 }
 0x472   :  { %2831 = vmatmul.mubr.msk.bf16.vlgmr.msra.gmra.mrb[76].mxu1 %vm204_vm2, %v1162_v15 }
 0x473   :  { %v3486_v27 = vpop.f32.mrb[48].mxu1 }
 0x474   :  { %v2533_v28 = vpack.c.bf16 %v3486_v27, %v3478_v56  ;;  %v2748_v37 = vpop.f32.mrb[49].mxu1  ;;  %v2514_v56 = vld [vmem:[%s3564_s2 + $0x9] ss:$0 sm:$0xff] }
 0x475   :  { %v1257_v57 = vpop.f32.mrb[50].mxu1  ;;  %2837 = vmatpush3.bf16.xpose.msra.mxu0 %v2038_v34 }
 0x476   :  { %v2749_v29 = vpop.f32.mrb[51].mxu1  ;;  %2854 = vmatprep.subr.bf16.mxu0 %v2959_v18 }
 0x47b   :  { %v3490_v31 = vpop.f32.mrb[24].mxu0 }
 0x47c   :  { %v2754_v48 = vpop.f32.mrb[25].mxu0 }
 0x47d   :  { %v1305_v33 = vpop.f32.mrb[26].mxu0 }
 0x47e   :  { %v2755_v6 = vpop.f32.mrb[27].mxu0 }
 0x4b0   :  { %v3492_v38 = vpop.f32.mrb[52].mxu1 }
 0x4b1   :  { %v2534_v8 = vpack.c.bf16 %v3492_v38, %v3490_v31  ;;  %v2760_v39 = vpop.f32.mrb[53].mxu1 }
 0x4b2   :  { %v1353_v1 = vpop.f32.mrb[54].mxu1 }
 0x4b3   :  { %v2761_v41 = vpop.f32.mrb[55].mxu1 }
 0x4e0   :  { %v1398_v42 = vpop.f32.mrb[28].mxu0 }
 0x4e1   :  { %v2766_v5 = vpop.f32.mrb[29].mxu0 }
 0x4e2   :  { %v1401_v63 = vpop.f32.mrb[30].mxu0 }
 0x4e3   :  { %v2767_v43 = vpop.f32.mrb[31].mxu0 }
 0x4e8   :  { %v1446_v45 = vpop.f32.mrb[56].mxu1 }
 0x4e9   :  { %v2535_v62 = vpack.c.bf16 %v1446_v45, %v1398_v42  ;;  %v2772_v21 = vpop.f32.mrb[57].mxu1 }
 0x4ea   :  { %v1449_v26 = vpop.f32.mrb[58].mxu1 }
 0x4eb   :  { %1968 = vrot.lane.b32.xlu0 %v2535_v62, %s2966_s11  ;;  %v2773_v36 = vpop.f32.mrb[59].mxu1 }
 0x4f5   :  { %v1494_v55 = vpop.f32.mrb[32].mxu0 }
 0x4f6   :  { %v2778_v44 = vpop.f32.mrb[33].mxu0 }
 0x4f7   :  { %v1497_v60 = vpop.f32.mrb[34].mxu0 }
 0x4f8   :  { %v2779_v49 = vpop.f32.mrb[35].mxu0  ;;  %v1542_v40 = vpop.f32.mrb[60].mxu1 }
 0x4f9   :  { %v2536_v47 = vpack.c.bf16 %v1542_v40, %v1494_v55  ;;  %v2784_v51 = vpop.f32.mrb[61].mxu1 }
 0x4fa   :  { %v1545_v53 = vpop.f32.mrb[62].mxu1 }
 0x4fb   :  { %1970 = vrot.lane.b32.xlu1 %v2536_v47, %s2966_s11  ;;  %v2785_v32 = vpop.f32.mrb[63].mxu1 }
 0x4fd   :  { %v1590_v46 = vpop.f32.mrb[36].mxu0 }
 0x4fe   :  { %v2790_v12 = vpop.f32.mrb[37].mxu0 }
 0x4ff   :  { %v1593_v61 = vpop.f32.mrb[38].mxu0 }
 0x500   :  { %v2791_v10 = vpop.f32.mrb[39].mxu0  ;;  %v1638_v22 = vpop.f32.mrb[64].mxu1 }
 0x501   :  { %v2537_v50 = vpack.c.bf16 %v1638_v22, %v1590_v46  ;;  %v2796_v19 = vpop.f32.mrb[65].mxu1 }
 0x502   :  { %v1641_v0 = vpop.f32.mrb[66].mxu1 }
 0x503   :  { %1982 = vrot.lane.b32.xlu0 %v2537_v50, %s2967_s14  ;;  %v2797_v2 = vpop.f32.mrb[67].mxu1 }
 0x505   :  { %v1686_v30 = vpop.f32.mrb[40].mxu0 }
 0x506   :  { %v2802_v3 = vpop.f32.mrb[41].mxu0 }
 0x507   :  { %v1689_v54 = vpop.f32.mrb[42].mxu0 }
 0x508   :  { %v2803_v11 = vpop.f32.mrb[43].mxu0  ;;  %v1734_v9 = vpop.f32.mrb[68].mxu1 }
 0x509   :  { %v2538_v7 = vpack.c.bf16 %v1734_v9, %v1686_v30  ;;  %v2808_v23 = vpop.f32.mrb[69].mxu1 }
 0x50a   :  { %v1737_v13 = vpop.f32.mrb[70].mxu1 }
 0x50b   :  { %1984 = vrot.lane.b32.xlu1 %v2538_v7, %s2967_s14  ;;  %v2809_v35 = vpop.f32.mrb[71].mxu1 }
 0x52a   :  { %v1782_v14 = vpop.f32.mrb[44].mxu0 }
 0x52b   :  { %v2814_v16 = vpop.f32.mrb[45].mxu0 }
 0x52c   :  { %v1785_v17 = vpop.f32.mrb[46].mxu0 }
 0x52d   :  { %v2815_v52 = vpop.f32.mrb[47].mxu0  ;;  %v2892_v17 = vld [vmem:[%s3562_s1 + $0x40] sm:$0xff]  }
 0x52e   :  { %2870 = vmatprep.subr.msk.bf16.mxu1 %vm80_vm0, %v2892_v17  ;;  %v2251_v52 = vsel %vm80_vm0, %v2892_v17, 0 }
 0x52f   :  { %2843 = vmatpush3.bf16.xpose.msra.mxu1 %v2251_v52 }
 0x53a   :  { %v1878_v59 = vpop.f32.mrb[48].mxu0 }
 0x53b   :  { %v2826_v24 = vpop.f32.mrb[49].mxu0 }
 0x53c   :  { %v1881_v4 = vpop.f32.mrb[50].mxu0 }
 0x53d   :  { %v1830_v15 = vpop.f32.mrb[72].mxu1  ;;  %v2827_v37 = vpop.f32.mrb[51].mxu0  ;;  %v2147_v4 = vlaneseq }
 0x53e   :  { %v2539_v57 = vpack.c.bf16 %v1830_v15, %v1782_v14  ;;  %v2820_v29 = vpop.f32.mrb[73].mxu1 }
 0x53f   :  { %v1833_v48 = vpop.f32.mrb[74].mxu1 }
 0x540   :  { %1996 = vrot.lane.b32.xlu0 %v2539_v57, %s2968_s17  ;;  %v2821_v33 = vpop.f32.mrb[75].mxu1 }
 0x541   :  { %v2148_v33 = vshrl.u32 %v2147_v4, 7 }
 0x545   :  { %v1926_v6 = vpop.f32.mrb[76].mxu1 }
 0x546   :  { %v2540_v39 = vpack.c.bf16 %v1926_v6, %v1878_v59  ;;  %v2832_v1 = vpop.f32.mrb[77].mxu1  ;;  %v2969_v59 = vmov 1966171168  }
 0x547   :  { %v1929_v41 = vpop.f32.mrb[78].mxu1  ;;  %v2145_v24 = vunpack.c.l.s4 %v2969_v59  ;;  %v2520_v1 = vld.sshfl [vmem:[%s3564_s2 + $0x4] sm:$0x33 pattern:$0x75316420] }
 0x548   :  { %v2833_v42 = vpop.f32.mrb[79].mxu1  ;;  %1998 = vrot.lane.b32.xlu1 %v2540_v39, %s2968_s17  ;;  %v2519_v39 = vld.sshfl [vmem:[%s3564_s2] sm:$0x33 pattern:$0x75316420] }
 0x549   :  { %v2146_v48 = vunpack.c.0.s8 %v2145_v24  ;;  %v2143_v42 = vcombine.high %v2519_v39, %v2519_v39 }
 0x55d   :  { %v1969_v5 = vpop.permute.xlu0 %1968 }
 0x55e   :  { %v2002_v43 = vsel %vm204_vm2, %v2533_v28, %v1969_v5  ;;  %v2149_v5 = vsub.s32 %v2146_v48, %v2148_v33  ;;  %v2525_v48 = vld [vmem:[%s3564_s2 + $0xb] ss:$0 sm:$0xff] }
 0x56d   :  { %v1971_v45 = vpop.permute.xlu1 %1970 }
 0x56e   :  { %v2005_v55 = vsel %vm204_vm2, %v2534_v8, %v1971_v45  ;;  %v2150_v45 = vrot.slane %v2519_v39, %v2149_v5 }
 0x575   :  { %v1983_v63 = vpop.permute.xlu0 %1982 }
 0x576   :  { %v2008_v62 = vsel %vm2006_vm4, %v2002_v43, %v1983_v63  ;;  %v2192_v43 = vcombine.high %v2520_v1, %v2520_v1 }
 0x57d   :  { %v1985_v36 = vpop.permute.xlu1 %1984 }
 0x57e   :  { %v2010_v44 = vsel %vm2006_vm4, %v2005_v55, %v1985_v36  ;;  %v2158_v36 = vcombine.high %v2150_v45, %v2150_v45 }
 0x5b2   :  { %v1997_v21 = vpop.permute.xlu0 %1996 }
 0x5b3   :  { %v2013_v26 = vsel %vm2011_vm5, %v2008_v62, %v1997_v21  ;;  %v2157_v62 = vrot.slane %v2143_v42, %v2149_v5  ;;  %v2199_v21 = vrot.slane %v2520_v1, %v2149_v5 }
 0x5b4   :  { %2838 = vmatprep.mubr.msk.bf16.mxu0 %vm80_vm0, %v2013_v26  ;;  %v2206_v26 = vrot.slane %v2192_v43, %v2149_v5 }
 0x5b5   :  { %v2159_v55 = vcombine.high %v2157_v62, %v2157_v62 }
 0x5ba   :  { %v1999_v60 = vpop.permute.xlu1 %1998 }
 0x5bb   :  { %v2015_v49 = vsel %vm2011_vm5, %v2010_v44, %v1999_v60  ;;  %v2162_v44 = vsub.s32 0, %v2148_v33  ;;  %v2207_v60 = vcombine.high %v2199_v21, %v2199_v21 }
 0x5bc   :  { %2839 = vmatmul.mubr.msk.bf16.vlgmr.msra.gmra.mrb[52].mxu0 %vm80_vm0, %v2015_v49  ;;  %v2208_v49 = vcombine.high %v2206_v26, %v2206_v26 }
 0x5bd   :  { %2858 = vmatprep.mubr.msk.bf16.mxu0 %vm2960_vm1, %v2959_v18 }
 0x68f   :  { %v2840_v27 = vpop.f32.mrb[52].mxu0 }
 0x690   :  { %v2074_v28 = vpop.f32.mrb[53].mxu0  ;;  %v2083_v38 = vadd.f32 %v2840_v27, %v2514_v56  ;;  %v2167_v27 = vrot.slane %v2157_v62, %v2162_v44 }
 0x691   :  { %v2075_v40 = vadd.f32 %v2514_v56, %v2074_v28  ;;  %v2841_v47 = vpop.f32.mrb[54].mxu0  ;;  %v2171_v28 = vrot.slane %v2158_v36, %v2162_v44 }
 0x692   :  { %v2077_v31 = vpop.f32.mrb[55].mxu0  ;;  %v2086_v32 = vadd.f32 %v2841_v47, %v2514_v56  ;;  %v2095_v46 = vsel %vm80_vm0, %v2083_v38, 0.0 }
 0x693   :  { %v2078_v8 = vadd.f32 %v2514_v56, %v2077_v31  ;;  %v2089_v51 = vsel %vm80_vm0, %v2075_v40, 0.0  ;;  %v2163_v56 = vrot.slane %v2150_v45, %v2162_v44  ;;  %v2212_v31 = vrot.slane %v2199_v21, %v2162_v44 }
 0x694   :  { %2090 = vadd.xlane.f32.xlu0 %v2089_v51  ;;  %v2098_v12 = vsel %vm80_vm0, %v2086_v32, 0.0  ;;  %v2224_v51 = vrot.slane %v2208_v49, %v2162_v44 }
 0x695   :  { %v2092_v53 = vsel %vm80_vm0, %v2078_v8, 0.0 }
 0x696   :  { %2093 = vadd.xlane.f32.xlu1 %v2092_v53 }
 0x698   :  { %2096 = vadd.xlane.f32.xlu0 %v2095_v46 }
 0x69c   :  { %2099 = vadd.xlane.f32.xlu0 %v2098_v12 }
 0x721   :  { %v2091_v58 = vpop.xlane.xlu0 %2090 }
 0x723   :  { %v2094_v61 = vpop.xlane.xlu1 %2093 }
 0x724   :  { %v2101_v10 = vadd.f32 %v2094_v61, %v2091_v58 }
 0x725   :  { %v2097_v22 = vpop.xlane.xlu0 %2096 }
 0x726   :  { %v2102_v25 = vadd.f32 %v2101_v10, %v2097_v22 }
 0x729   :  { %v2100_v50 = vpop.xlane.xlu0 %2099 }
 0x72a   :  { %v2103_v19 = vadd.f32 %v2102_v25, %v2100_v50 }
 0x72c   :  { %v2104_v0 = vmul.f32 0.0078125, %v2103_v19 }
 0x72e   :  { %v2106_v2 = vsub.f32 %v2078_v8, %v2104_v0  ;;  %v2105_v30 = vsub.f32 %v2075_v40, %v2104_v0  ;;  %v2108_v3 = vsub.f32 %v2086_v32, %v2104_v0  ;;  %v2107_v54 = vsub.f32 %v2083_v38, %v2104_v0 }
 0x72f   :  { %v2175_v40 = vrot.slane %v2159_v55, %v2162_v44  ;;  %v2216_v38 = vrot.slane %v2206_v26, %v2162_v44  ;;  %v2220_v8 = vrot.slane %v2207_v60, %v2162_v44 }
 0x730   :  { %v2110_v11 = vmul.f32 %v2106_v2, %v2106_v2  ;;  %v2109_v9 = vmul.f32 %v2105_v30, %v2105_v30  ;;  %v2112_v13 = vmul.f32 %v2108_v3, %v2108_v3  ;;  %v2111_v35 = vmul.f32 %v2107_v54, %v2107_v54 }
 0x732   :  { %v2116_v7 = vsel %vm80_vm0, %v2110_v11, 0.0  ;;  %v2113_v23 = vsel %vm80_vm0, %v2109_v9, 0.0  ;;  %v2122_v14 = vsel %vm80_vm0, %v2112_v13, 0.0  ;;  %v2119_v16 = vsel %vm80_vm0, %v2111_v35, 0.0 }
 0x733   :  { %2117 = vadd.xlane.f32.xlu0 %v2116_v7  ;;  %2114 = vadd.xlane.f32.xlu1 %v2113_v23 }
 0x737   :  { %2123 = vadd.xlane.f32.xlu0 %v2122_v14  ;;  %2120 = vadd.xlane.f32.xlu1 %v2119_v16 }
 0x7c0   :  { %v2118_v20 = vpop.xlane.xlu0 %2117  ;;  %v2115_v34 = vpop.xlane.xlu1 %2114 }
 0x7c1   :  { %v2125_v15 = vadd.f32 %v2118_v20, %v2115_v34 }
 0x7c4   :  { %v2121_v37 = vpop.xlane.xlu1 %2120  ;;  %v2124_v29 = vpop.xlane.xlu0 %2123 }
 0x7c5   :  { %v2126_v57 = vadd.f32 %v2125_v15, %v2121_v37 }
 0x7c7   :  { %v2127_v6 = vadd.f32 %v2126_v57, %v2124_v29 }
 0x7c9   :  { %v2128_v41 = vmul.f32 0.0078125, %v2127_v6 }
 0x7cb   :  { %v2129_v63 = vadd.f32 1e-05, %v2128_v41 }
 0x7cd   :  { %2957 = vrsqrt.f32 %v2129_v63 }
 0x7d7   :  { %v2958_v47 = vpop.eup %2957 }
 0x7d8   :  { %v2131_v53 = vmul.f32 %v2958_v47, %v2105_v30  ;;  %v2132_v32 = vmul.f32 %v2958_v47, %v2106_v2  ;;  %v2133_v46 = vmul.f32 %v2958_v47, %v2107_v54  ;;  %v2134_v12 = vmul.f32 %v2958_v47, %v2108_v3  ;;  %v33_v2 = vld [vmem:[%s3562_s1 + $0x48] sm:$0x7] }
 0x7d9   :  { %2871 = vmatprep.subr.msk.bf16.mxu1 %vm2006_vm4, %v33_v2  ;;  %v2327_v30 = vsel %vm2006_vm4, %v33_v2, 0  ;;  %v2521_v3 = vld [vmem:[%s3564_s2 + $0xa] ss:$0 sm:$0xff] }
 0x7da   :  { %v2180_v58 = vmul.f32 %v2163_v56, %v2131_v53  ;;  %v2181_v61 = vmul.f32 %v2167_v27, %v2132_v32  ;;  %v2182_v10 = vmul.f32 %v2171_v28, %v2133_v46  ;;  %v2183_v22 = vmul.f32 %v2175_v40, %v2134_v12 }
 0x7db   :  { %v2970_v28 = vmov 0.20019531|0.20019531  }
 0x7dc   :  { %v2229_v25 = vadd.f32 %v2212_v31, %v2180_v58  ;;  %v2230_v50 = vadd.f32 %v2216_v38, %v2181_v61  ;;  %v2231_v19 = vadd.f32 %v2220_v8, %v2182_v10  ;;  %v2232_v0 = vadd.f32 %v2224_v51, %v2183_v22 }
 0x7de   :  { %v2233_v11 = vpack.c.bf16 %v2230_v50, %v2229_v25  ;;  %v2234_v9 = vpack.c.bf16 %v2232_v0, %v2231_v19 }
 0x7e0   :  { %2844 = vmatprep.mubr.msk.bf16.mxu1 %vm80_vm0, %v2233_v11 }
 0x7e1   :  { %2845 = vmatmul.mubr.msk.bf16.vlgmr.msra.gmra.mrb[80].mxu1 %vm80_vm0, %v2234_v9 }
 0x7e2   :  { %2849 = vmatpush3.bf16.xpose.msra.mxu1 %v2327_v30 }
 0x8b4   :  { %v2846_v54 = vpop.f32.mrb[80].mxu1 }
 0x8b5   :  { %v2296_v7 = vadd.f32 %v2846_v54, %v2521_v3  ;;  %v2287_v23 = vpop.f32.mrb[81].mxu1 }
 0x8b6   :  { %v2288_v13 = vadd.f32 %v2521_v3, %v2287_v23  ;;  %v2847_v35 = vpop.f32.mrb[82].mxu1 }
 0x8b7   :  { %v2308_v14 = vmul.f32 0.01, %v2296_v7  ;;  %v2299_v16 = vadd.f32 %v2847_v35, %v2521_v3  ;;  %v2290_v17 = vpop.f32.mrb[83].mxu1  ;;  %vm2304_vm6 = vcmp.ge.f32.partialorder %v2296_v7, 0.0 }
 0x8b8   :  { %v2306_v52 = vmul.f32 0.01, %v2288_v13  ;;  %v2291_v20 = vadd.f32 %v2521_v3, %v2290_v17  ;;  %vm2302_vm7 = vcmp.ge.f32.partialorder %v2288_v13, 0.0 }
 0x8b9   :  { %vm2305_vm8 = vcmp.ge.f32.partialorder %v2299_v16, 0.0  ;;  %v2309_v34 = vmul.f32 0.01, %v2299_v16  ;;  %v2312_v24 = vsel %vm2304_vm6, %v2296_v7, %v2308_v14 }
 0x8ba   :  { %vm2303_vm9 = vcmp.ge.f32.partialorder %v2291_v20, 0.0  ;;  %v2307_v59 = vmul.f32 0.01, %v2291_v20  ;;  %v2310_v15 = vsel %vm2302_vm7, %v2288_v13, %v2306_v52 }
 0x8bb   :  { %v2313_v4 = vsel %vm2305_vm8, %v2299_v16, %v2309_v34 }
 0x8bc   :  { %v2315_v37 = vpack.c.bf16 %v2313_v4, %v2312_v24  ;;  %v2311_v57 = vsel %vm2303_vm9, %v2291_v20, %v2307_v59 }
 0x8bd   :  { %v2314_v29 = vpack.c.bf16 %v2311_v57, %v2310_v15 }
 0x8bf   :  { %2850 = vmatprep.mubr.msk.bf16.mxu1 %vm2006_vm4, %v2314_v29 }
 0x8c0   :  { %2851 = vmatmul.mubr.msk.bf16.vlgmr.msra.gmra.mrb[84].mxu1 %vm2006_vm4, %v2315_v37 }
 0x993   :  { %v2852_v33 = vpop.f32.mrb[84].mxu1 }
 0x994   :  { %v2372_v6 = vadd.f32 %v2852_v33, %v2525_v48  ;;  %v2363_v39 = vpop.f32.mrb[85].mxu1 }
 0x995   :  { %v2364_v1 = vadd.f32 %v2525_v48, %v2363_v39  ;;  %v2853_v41 = vpop.f32.mrb[86].mxu1 }
 0x996   :  { %v2384_v42 = vmul.f32 0.01, %v2372_v6  ;;  %v2375_v5 = vadd.f32 %v2853_v41, %v2525_v48  ;;  %v2366_v63 = vpop.f32.mrb[87].mxu1  ;;  %vm2380_vm10 = vcmp.ge.f32.partialorder %v2372_v6, 0.0 }
 0x997   :  { %v2382_v43 = vmul.f32 0.01, %v2364_v1  ;;  %v2367_v45 = vadd.f32 %v2525_v48, %v2366_v63  ;;  %vm2378_vm11 = vcmp.ge.f32.partialorder %v2364_v1, 0.0 }
 0x998   :  { %vm2381_vm12 = vcmp.ge.f32.partialorder %v2375_v5, 0.0  ;;  %v2385_v62 = vmul.f32 0.01, %v2375_v5  ;;  %v2388_v26 = vsel %vm2380_vm10, %v2372_v6, %v2384_v42 }
 0x999   :  { %vm2379_vm13 = vcmp.ge.f32.partialorder %v2367_v45, 0.0  ;;  %v2383_v21 = vmul.f32 0.01, %v2367_v45  ;;  %v2386_v55 = vsel %vm2378_vm11, %v2364_v1, %v2382_v43 }
 0x99a   :  { %v2389_v36 = vsel %vm2381_vm12, %v2375_v5, %v2385_v62 }
 0x99b   :  { %v2387_v44 = vsel %vm2379_vm13, %v2367_v45, %v2383_v21  ;;  %v2392_v60 = vpack.c.bf16 %v2389_v36, %v2388_v26 }
 0x99c   :  { %v2391_v49 = vpack.c.bf16 %v2387_v44, %v2386_v55 }
 0x99d   :  { %v2401_v27 = vsel %vm2393_vm14, %v2392_v60, 0 }
 0x99e   :  { %v2398_v56 = vsel %vm2393_vm14, %v2391_v49, 0 }
 0x99f   :  { %2855 = vmatpush3.bf16.xpose.msra.mxu0 %v2398_v56 }
 0x9a0   :  { %2856 = vmatprep.subr.bf16.mxu0 %v2959_v18 }
 0x9a7   :  { %2857 = vmatpush3.bf16.xpose.msra.mxu0 %v2401_v27 }
 0x9ae   :  { %2859 = vmatmul.mubr.msk.bf16.vlgmr.msra.gmra.mrb[56].mxu0 %vm2393_vm14, %v2970_v28 }
 0xa81   :  { %v2437_v40 = vpop.f32.mrb[56].mxu0 }
 0xa82   :  { %2444 = vst.msk [vmem:[%s3565_s3] sm:$0x1] %vm2443_vm15, %v2437_v40  ;;  %v2860_v47 = vpop.f32.mrb[57].mxu0 }
 0xa83   :  { %v2440_v31 = vpop.f32.mrb[58].mxu0 }
 0xa84   :  { %v2861_v38 = vpop.f32.mrb[59].mxu0 }

</bundles_post_ra>
